<compile_context>
chip_gen: v6e
topology: v6e:2x2x1
jax: 0.10.0
libtpu: 0.0.40
codegen_flags: <defaults>
</compile_context>

<pallas_src>
import jax
import jax.numpy as jnp
from jax.experimental import pallas as pl
from jax.experimental.pallas import tpu as pltpu

# ----------------------------------------------------------------------------
# Network dimensions and packed-parameter layout (matches nn.Linear shapes;
# weights are stored transposed as (in_features, out_features), row-major).
# ----------------------------------------------------------------------------
D_IN, H1, H2, H3, D_OUT = 1, 8, 10, 10, 1

OFF_W1 = 0
OFF_B1 = OFF_W1 + D_IN * H1      # 8
OFF_W2 = OFF_B1 + H1             # 16
OFF_B2 = OFF_W2 + H1 * H2        # 96
OFF_W3 = OFF_B2 + H2             # 106
OFF_B3 = OFF_W3 + H2 * H3        # 206
OFF_W4 = OFF_B3 + H3             # 216
OFF_B4 = OFF_W4 + H3 * D_OUT     # 226
N_PARAMS = OFF_B4 + D_OUT        # 227 f32 scalars (pads to 1 KiB in SMEM)

LANES = 128                      # batch lives along the 128-lane axis


def mlp_kernel(p_ref, x_ref, o_ref):
    """p_ref: SMEM f32[N_PARAMS] (scalar-prefetched packed weights/biases).
    x_ref / o_ref: VMEM (tb, 128) lane-dense batch tiles."""
    x = x_ref[...]
    if x.dtype != jnp.float32:            # trace-time branch; f32 in the demo
        x = x.astype(jnp.float32)

    # Layer 1: 1 -> 8.  K = 1, so each hidden unit is one broadcast
    # multiply-add with the bias and ReLU fused into the same elementwise pass.
    h = [jnp.maximum(x * p_ref[OFF_W1 + j] + p_ref[OFF_B1 + j], 0.0)
         for j in range(H1)]

    def dense(h_in, n_in, n_out, off_w, off_b, relu):
        # Fully unrolled VPU multiply-adds over <= 10 lane-dense slabs per
        # output unit; weights come from SMEM as scalars (splat into vregs
        # once per tile).  LLO interleaves the independent output chains.
        outs = []
        for k in range(n_out):
            acc = h_in[0] * p_ref[off_w + 0 * n_out + k]
            for j in range(1, n_in):
                acc = acc + h_in[j] * p_ref[off_w + j * n_out + k]
            acc = acc + p_ref[off_b + k]
            outs.append(jnp.maximum(acc, 0.0) if relu else acc)
        return outs

    h = dense(h, H1, H2, OFF_W2, OFF_B2, relu=True)          # 8  -> 10, ReLU
    h = dense(h, H2, H3, OFF_W3, OFF_B3, relu=True)          # 10 -> 10, ReLU
    o = dense(h, H3, D_OUT, OFF_W4, OFF_B4, relu=False)[0]   # 10 -> 1

    o_ref[...] = o.astype(o_ref.dtype)


def pack_params(params):
    """Flatten all weights (as W.T, row-major) and biases into one f32 vector."""
    (w1, b1), (w2, b2), (w3, b3), (w4, b4) = (
        params["h1"], params["h2"], params["h3"], params["out"])
    flat = jnp.concatenate([
        w1.reshape(-1), b1.reshape(-1),
        w2.reshape(-1), b2.reshape(-1),
        w3.reshape(-1), b3.reshape(-1),
        w4.reshape(-1), b4.reshape(-1),
    ]).astype(jnp.float32)
    assert flat.shape == (N_PARAMS,)
    return flat


def net_forward(x, params, *, block_rows=512):
    """x: (N, 1) float32 -> (N, 1) float32.

    The batch is laid out lane-dense as (rows, 128); padded samples (zeros)
    are computed and discarded, so ragged N is supported.  block_rows=512
    => 256 KiB per f32 block; double-buffered in+out plus ~20 live hidden
    slabs stays well inside the default scoped VMEM on v5e / v6e / v7x.
    """
    N, fin = x.shape
    assert fin == 1

    rows_needed = pl.cdiv(N, LANES)
    # Row tile: multiple of 8 (sublane tiling), at most block_rows.
    tb = max(8, min(block_rows, ((rows_needed + 7) // 8) * 8))
    rows_padded = pl.cdiv(rows_needed, tb) * tb
    n_padded = rows_padded * LANES

    x_flat = jnp.pad(x.reshape(-1), (0, n_padded - N))
    x2 = x_flat.reshape(rows_padded, LANES)

    p = pack_params(params)

    out2 = pl.pallas_call(
        mlp_kernel,
        out_shape=jax.ShapeDtypeStruct((rows_padded, LANES), x.dtype),
        grid_spec=pltpu.PrefetchScalarGridSpec(
            num_scalar_prefetch=1,                        # packed params -> SMEM
            grid=(rows_padded // tb,),
            in_specs=[pl.BlockSpec((tb, LANES), lambda i, p_ref: (i, 0))],
            out_specs=pl.BlockSpec((tb, LANES), lambda i, p_ref: (i, 0)),
        ),
        compiler_params=pltpu.CompilerParams(
            dimension_semantics=("parallel",)),           # megacore-friendly
    )(p, x2)

    return out2.reshape(-1)[:N].reshape(N, 1)


def init_params(key):
    """Deterministic init mirroring nn.Linear; weights stored as W.T (in, out)."""
    dims = [("h1", D_IN, H1), ("h2", H1, H2), ("h3", H2, H3), ("out", H3, D_OUT)]
    params = {}
    for name, fan_in, fan_out in dims:
        key, kw, kb = jax.random.split(key, 3)
        bound = 1.0 / (fan_in ** 0.5)     # PyTorch default uniform bound
        w_t = jax.random.uniform(kw, (fan_in, fan_out), jnp.float32,
                                 minval=-bound, maxval=bound)
        b = jax.random.uniform(kb, (fan_out,), jnp.float32,
                               minval=-bound, maxval=bound)
        params[name] = (w_t, b)
    return params


def net_forward_ref(x, params):
    """Pure-JAX reference for correctness check."""
    h = x
    for name in ("h1", "h2", "h3"):
        w_t, b = params[name]
        h = jnp.maximum(h @ w_t + b, 0.0)
    w_t, b = params["out"]
    return h @ w_t + b


if __name__ == "__main__":
    key = jax.random.PRNGKey(0)
    key, kx = jax.random.split(key)

    N = 300  # small, intentionally ragged batch; x = unsqueeze(x, 1) -> (N, 1)
    x = jax.random.normal(kx, (N, 1), jnp.float32)

    params = init_params(key)

    out = jax.block_until_ready(net_forward(x, params))
    ref = net_forward_ref(x, params)

    assert out.shape == (N, 1)
    assert jnp.allclose(out, ref, atol=1e-5, rtol=1e-5)

    print("KERNEL_OK")
</pallas_src>

<mosaic_0001>
module attributes {stable_mosaic.version = 11 : i64} {
  func.func @mlp_kernel(%arg0: i32, %arg1: memref<227xf32, #tpu.memory_space<smem>>, %arg2: memref<8x128xf32, #tpu.memory_space<vmem>>, %arg3: memref<8x128xf32, #tpu.memory_space<vmem>>) attributes {dimension_semantics = [#tpu.dimension_semantics<parallel>], iteration_bounds = array<i64: 1>, scalar_prefetch = 1 : i64, scratch_operands = 0 : i64, tpu.core_type = #tpu.core_type<tc>, window_params = [{transform_indices = @transform_0, window_bounds = array<i64: 8, 128>}, {transform_indices = @transform_1, window_bounds = array<i64: 8, 128>}]} {
    %c0 = arith.constant 0 : index
    %c0_0 = arith.constant 0 : index
    %0 = vector.load %arg2[%c0, %c0_0] : memref<8x128xf32, #tpu.memory_space<vmem>>, vector<8x128xf32>
    %c0_1 = arith.constant 0 : index
    %1 = memref.load %arg1[%c0_1] : memref<227xf32, #tpu.memory_space<smem>>
    %2 = vector.broadcast %1 : f32 to vector<8x128xf32>
    %3 = arith.mulf %0, %2 : vector<8x128xf32>
    %c8 = arith.constant 8 : index
    %4 = memref.load %arg1[%c8] : memref<227xf32, #tpu.memory_space<smem>>
    %5 = vector.broadcast %4 : f32 to vector<8x128xf32>
    %6 = arith.addf %3, %5 : vector<8x128xf32>
    %cst = arith.constant 0.000000e+00 : f32
    %7 = vector.broadcast %cst : f32 to vector<8x128xf32>
    %8 = arith.maximumf %6, %7 : vector<8x128xf32>
    %c1 = arith.constant 1 : index
    %9 = memref.load %arg1[%c1] : memref<227xf32, #tpu.memory_space<smem>>
    %10 = vector.broadcast %9 : f32 to vector<8x128xf32>
    %11 = arith.mulf %0, %10 : vector<8x128xf32>
    %c9 = arith.constant 9 : index
    %12 = memref.load %arg1[%c9] : memref<227xf32, #tpu.memory_space<smem>>
    %13 = vector.broadcast %12 : f32 to vector<8x128xf32>
    %14 = arith.addf %11, %13 : vector<8x128xf32>
    %cst_2 = arith.constant 0.000000e+00 : f32
    %15 = vector.broadcast %cst_2 : f32 to vector<8x128xf32>
    %16 = arith.maximumf %14, %15 : vector<8x128xf32>
    %c2 = arith.constant 2 : index
    %17 = memref.load %arg1[%c2] : memref<227xf32, #tpu.memory_space<smem>>
    %18 = vector.broadcast %17 : f32 to vector<8x128xf32>
    %19 = arith.mulf %0, %18 : vector<8x128xf32>
    %c10 = arith.constant 10 : index
    %20 = memref.load %arg1[%c10] : memref<227xf32, #tpu.memory_space<smem>>
    %21 = vector.broadcast %20 : f32 to vector<8x128xf32>
    %22 = arith.addf %19, %21 : vector<8x128xf32>
    %cst_3 = arith.constant 0.000000e+00 : f32
    %23 = vector.broadcast %cst_3 : f32 to vector<8x128xf32>
    %24 = arith.maximumf %22, %23 : vector<8x128xf32>
    %c3 = arith.constant 3 : index
    %25 = memref.load %arg1[%c3] : memref<227xf32, #tpu.memory_space<smem>>
    %26 = vector.broadcast %25 : f32 to vector<8x128xf32>
    %27 = arith.mulf %0, %26 : vector<8x128xf32>
    %c11 = arith.constant 11 : index
    %28 = memref.load %arg1[%c11] : memref<227xf32, #tpu.memory_space<smem>>
    %29 = vector.broadcast %28 : f32 to vector<8x128xf32>
    %30 = arith.addf %27, %29 : vector<8x128xf32>
    %cst_4 = arith.constant 0.000000e+00 : f32
    %31 = vector.broadcast %cst_4 : f32 to vector<8x128xf32>
    %32 = arith.maximumf %30, %31 : vector<8x128xf32>
    %c4 = arith.constant 4 : index
    %33 = memref.load %arg1[%c4] : memref<227xf32, #tpu.memory_space<smem>>
    %34 = vector.broadcast %33 : f32 to vector<8x128xf32>
    %35 = arith.mulf %0, %34 : vector<8x128xf32>
    %c12 = arith.constant 12 : index
    %36 = memref.load %arg1[%c12] : memref<227xf32, #tpu.memory_space<smem>>
    %37 = vector.broadcast %36 : f32 to vector<8x128xf32>
    %38 = arith.addf %35, %37 : vector<8x128xf32>
    %cst_5 = arith.constant 0.000000e+00 : f32
    %39 = vector.broadcast %cst_5 : f32 to vector<8x128xf32>
    %40 = arith.maximumf %38, %39 : vector<8x128xf32>
    %c5 = arith.constant 5 : index
    %41 = memref.load %arg1[%c5] : memref<227xf32, #tpu.memory_space<smem>>
    %42 = vector.broadcast %41 : f32 to vector<8x128xf32>
    %43 = arith.mulf %0, %42 : vector<8x128xf32>
    %c13 = arith.constant 13 : index
    %44 = memref.load %arg1[%c13] : memref<227xf32, #tpu.memory_space<smem>>
    %45 = vector.broadcast %44 : f32 to vector<8x128xf32>
    %46 = arith.addf %43, %45 : vector<8x128xf32>
    %cst_6 = arith.constant 0.000000e+00 : f32
    %47 = vector.broadcast %cst_6 : f32 to vector<8x128xf32>
    %48 = arith.maximumf %46, %47 : vector<8x128xf32>
    %c6 = arith.constant 6 : index
    %49 = memref.load %arg1[%c6] : memref<227xf32, #tpu.memory_space<smem>>
    %50 = vector.broadcast %49 : f32 to vector<8x128xf32>
    %51 = arith.mulf %0, %50 : vector<8x128xf32>
    %c14 = arith.constant 14 : index
    %52 = memref.load %arg1[%c14] : memref<227xf32, #tpu.memory_space<smem>>
    %53 = vector.broadcast %52 : f32 to vector<8x128xf32>
    %54 = arith.addf %51, %53 : vector<8x128xf32>
    %cst_7 = arith.constant 0.000000e+00 : f32
    %55 = vector.broadcast %cst_7 : f32 to vector<8x128xf32>
    %56 = arith.maximumf %54, %55 : vector<8x128xf32>
    %c7 = arith.constant 7 : index
    %57 = memref.load %arg1[%c7] : memref<227xf32, #tpu.memory_space<smem>>
    %58 = vector.broadcast %57 : f32 to vector<8x128xf32>
    %59 = arith.mulf %0, %58 : vector<8x128xf32>
    %c15 = arith.constant 15 : index
    %60 = memref.load %arg1[%c15] : memref<227xf32, #tpu.memory_space<smem>>
    %61 = vector.broadcast %60 : f32 to vector<8x128xf32>
    %62 = arith.addf %59, %61 : vector<8x128xf32>
    %cst_8 = arith.constant 0.000000e+00 : f32
    %63 = vector.broadcast %cst_8 : f32 to vector<8x128xf32>
    %64 = arith.maximumf %62, %63 : vector<8x128xf32>
    %c16 = arith.constant 16 : index
    %65 = memref.load %arg1[%c16] : memref<227xf32, #tpu.memory_space<smem>>
    %66 = vector.broadcast %65 : f32 to vector<8x128xf32>
    %67 = arith.mulf %8, %66 : vector<8x128xf32>
    %c26 = arith.constant 26 : index
    %68 = memref.load %arg1[%c26] : memref<227xf32, #tpu.memory_space<smem>>
    %69 = vector.broadcast %68 : f32 to vector<8x128xf32>
    %70 = arith.mulf %16, %69 : vector<8x128xf32>
    %71 = arith.addf %67, %70 : vector<8x128xf32>
    %c36 = arith.constant 36 : index
    %72 = memref.load %arg1[%c36] : memref<227xf32, #tpu.memory_space<smem>>
    %73 = vector.broadcast %72 : f32 to vector<8x128xf32>
    %74 = arith.mulf %24, %73 : vector<8x128xf32>
    %75 = arith.addf %71, %74 : vector<8x128xf32>
    %c46 = arith.constant 46 : index
    %76 = memref.load %arg1[%c46] : memref<227xf32, #tpu.memory_space<smem>>
    %77 = vector.broadcast %76 : f32 to vector<8x128xf32>
    %78 = arith.mulf %32, %77 : vector<8x128xf32>
    %79 = arith.addf %75, %78 : vector<8x128xf32>
    %c56 = arith.constant 56 : index
    %80 = memref.load %arg1[%c56] : memref<227xf32, #tpu.memory_space<smem>>
    %81 = vector.broadcast %80 : f32 to vector<8x128xf32>
    %82 = arith.mulf %40, %81 : vector<8x128xf32>
    %83 = arith.addf %79, %82 : vector<8x128xf32>
    %c66 = arith.constant 66 : index
    %84 = memref.load %arg1[%c66] : memref<227xf32, #tpu.memory_space<smem>>
    %85 = vector.broadcast %84 : f32 to vector<8x128xf32>
    %86 = arith.mulf %48, %85 : vector<8x128xf32>
    %87 = arith.addf %83, %86 : vector<8x128xf32>
    %c76 = arith.constant 76 : index
    %88 = memref.load %arg1[%c76] : memref<227xf32, #tpu.memory_space<smem>>
    %89 = vector.broadcast %88 : f32 to vector<8x128xf32>
    %90 = arith.mulf %56, %89 : vector<8x128xf32>
    %91 = arith.addf %87, %90 : vector<8x128xf32>
    %c86 = arith.constant 86 : index
    %92 = memref.load %arg1[%c86] : memref<227xf32, #tpu.memory_space<smem>>
    %93 = vector.broadcast %92 : f32 to vector<8x128xf32>
    %94 = arith.mulf %64, %93 : vector<8x128xf32>
    %95 = arith.addf %91, %94 : vector<8x128xf32>
    %c96 = arith.constant 96 : index
    %96 = memref.load %arg1[%c96] : memref<227xf32, #tpu.memory_space<smem>>
    %97 = vector.broadcast %96 : f32 to vector<8x128xf32>
    %98 = arith.addf %95, %97 : vector<8x128xf32>
    %cst_9 = arith.constant 0.000000e+00 : f32
    %99 = vector.broadcast %cst_9 : f32 to vector<8x128xf32>
    %100 = arith.maximumf %98, %99 : vector<8x128xf32>
    %c17 = arith.constant 17 : index
    %101 = memref.load %arg1[%c17] : memref<227xf32, #tpu.memory_space<smem>>
    %102 = vector.broadcast %101 : f32 to vector<8x128xf32>
    %103 = arith.mulf %8, %102 : vector<8x128xf32>
    %c27 = arith.constant 27 : index
    %104 = memref.load %arg1[%c27] : memref<227xf32, #tpu.memory_space<smem>>
    %105 = vector.broadcast %104 : f32 to vector<8x128xf32>
    %106 = arith.mulf %16, %105 : vector<8x128xf32>
    %107 = arith.addf %103, %106 : vector<8x128xf32>
    %c37 = arith.constant 37 : index
    %108 = memref.load %arg1[%c37] : memref<227xf32, #tpu.memory_space<smem>>
    %109 = vector.broadcast %108 : f32 to vector<8x128xf32>
    %110 = arith.mulf %24, %109 : vector<8x128xf32>
    %111 = arith.addf %107, %110 : vector<8x128xf32>
    %c47 = arith.constant 47 : index
    %112 = memref.load %arg1[%c47] : memref<227xf32, #tpu.memory_space<smem>>
    %113 = vector.broadcast %112 : f32 to vector<8x128xf32>
    %114 = arith.mulf %32, %113 : vector<8x128xf32>
    %115 = arith.addf %111, %114 : vector<8x128xf32>
    %c57 = arith.constant 57 : index
    %116 = memref.load %arg1[%c57] : memref<227xf32, #tpu.memory_space<smem>>
    %117 = vector.broadcast %116 : f32 to vector<8x128xf32>
    %118 = arith.mulf %40, %117 : vector<8x128xf32>
    %119 = arith.addf %115, %118 : vector<8x128xf32>
    %c67 = arith.constant 67 : index
    %120 = memref.load %arg1[%c67] : memref<227xf32, #tpu.memory_space<smem>>
    %121 = vector.broadcast %120 : f32 to vector<8x128xf32>
    %122 = arith.mulf %48, %121 : vector<8x128xf32>
    %123 = arith.addf %119, %122 : vector<8x128xf32>
    %c77 = arith.constant 77 : index
    %124 = memref.load %arg1[%c77] : memref<227xf32, #tpu.memory_space<smem>>
    %125 = vector.broadcast %124 : f32 to vector<8x128xf32>
    %126 = arith.mulf %56, %125 : vector<8x128xf32>
    %127 = arith.addf %123, %126 : vector<8x128xf32>
    %c87 = arith.constant 87 : index
    %128 = memref.load %arg1[%c87] : memref<227xf32, #tpu.memory_space<smem>>
    %129 = vector.broadcast %128 : f32 to vector<8x128xf32>
    %130 = arith.mulf %64, %129 : vector<8x128xf32>
    %131 = arith.addf %127, %130 : vector<8x128xf32>
    %c97 = arith.constant 97 : index
    %132 = memref.load %arg1[%c97] : memref<227xf32, #tpu.memory_space<smem>>
    %133 = vector.broadcast %132 : f32 to vector<8x128xf32>
    %134 = arith.addf %131, %133 : vector<8x128xf32>
    %cst_10 = arith.constant 0.000000e+00 : f32
    %135 = vector.broadcast %cst_10 : f32 to vector<8x128xf32>
    %136 = arith.maximumf %134, %135 : vector<8x128xf32>
    %c18 = arith.constant 18 : index
    %137 = memref.load %arg1[%c18] : memref<227xf32, #tpu.memory_space<smem>>
    %138 = vector.broadcast %137 : f32 to vector<8x128xf32>
    %139 = arith.mulf %8, %138 : vector<8x128xf32>
    %c28 = arith.constant 28 : index
    %140 = memref.load %arg1[%c28] : memref<227xf32, #tpu.memory_space<smem>>
    %141 = vector.broadcast %140 : f32 to vector<8x128xf32>
    %142 = arith.mulf %16, %141 : vector<8x128xf32>
    %143 = arith.addf %139, %142 : vector<8x128xf32>
    %c38 = arith.constant 38 : index
    %144 = memref.load %arg1[%c38] : memref<227xf32, #tpu.memory_space<smem>>
    %145 = vector.broadcast %144 : f32 to vector<8x128xf32>
    %146 = arith.mulf %24, %145 : vector<8x128xf32>
    %147 = arith.addf %143, %146 : vector<8x128xf32>
    %c48 = arith.constant 48 : index
    %148 = memref.load %arg1[%c48] : memref<227xf32, #tpu.memory_space<smem>>
    %149 = vector.broadcast %148 : f32 to vector<8x128xf32>
    %150 = arith.mulf %32, %149 : vector<8x128xf32>
    %151 = arith.addf %147, %150 : vector<8x128xf32>
    %c58 = arith.constant 58 : index
    %152 = memref.load %arg1[%c58] : memref<227xf32, #tpu.memory_space<smem>>
    %153 = vector.broadcast %152 : f32 to vector<8x128xf32>
    %154 = arith.mulf %40, %153 : vector<8x128xf32>
    %155 = arith.addf %151, %154 : vector<8x128xf32>
    %c68 = arith.constant 68 : index
    %156 = memref.load %arg1[%c68] : memref<227xf32, #tpu.memory_space<smem>>
    %157 = vector.broadcast %156 : f32 to vector<8x128xf32>
    %158 = arith.mulf %48, %157 : vector<8x128xf32>
    %159 = arith.addf %155, %158 : vector<8x128xf32>
    %c78 = arith.constant 78 : index
    %160 = memref.load %arg1[%c78] : memref<227xf32, #tpu.memory_space<smem>>
    %161 = vector.broadcast %160 : f32 to vector<8x128xf32>
    %162 = arith.mulf %56, %161 : vector<8x128xf32>
    %163 = arith.addf %159, %162 : vector<8x128xf32>
    %c88 = arith.constant 88 : index
    %164 = memref.load %arg1[%c88] : memref<227xf32, #tpu.memory_space<smem>>
    %165 = vector.broadcast %164 : f32 to vector<8x128xf32>
    %166 = arith.mulf %64, %165 : vector<8x128xf32>
    %167 = arith.addf %163, %166 : vector<8x128xf32>
    %c98 = arith.constant 98 : index
    %168 = memref.load %arg1[%c98] : memref<227xf32, #tpu.memory_space<smem>>
    %169 = vector.broadcast %168 : f32 to vector<8x128xf32>
    %170 = arith.addf %167, %169 : vector<8x128xf32>
    %cst_11 = arith.constant 0.000000e+00 : f32
    %171 = vector.broadcast %cst_11 : f32 to vector<8x128xf32>
    %172 = arith.maximumf %170, %171 : vector<8x128xf32>
    %c19 = arith.constant 19 : index
    %173 = memref.load %arg1[%c19] : memref<227xf32, #tpu.memory_space<smem>>
    %174 = vector.broadcast %173 : f32 to vector<8x128xf32>
    %175 = arith.mulf %8, %174 : vector<8x128xf32>
    %c29 = arith.constant 29 : index
    %176 = memref.load %arg1[%c29] : memref<227xf32, #tpu.memory_space<smem>>
    %177 = vector.broadcast %176 : f32 to vector<8x128xf32>
    %178 = arith.mulf %16, %177 : vector<8x128xf32>
    %179 = arith.addf %175, %178 : vector<8x128xf32>
    %c39 = arith.constant 39 : index
    %180 = memref.load %arg1[%c39] : memref<227xf32, #tpu.memory_space<smem>>
    %181 = vector.broadcast %180 : f32 to vector<8x128xf32>
    %182 = arith.mulf %24, %181 : vector<8x128xf32>
    %183 = arith.addf %179, %182 : vector<8x128xf32>
    %c49 = arith.constant 49 : index
    %184 = memref.load %arg1[%c49] : memref<227xf32, #tpu.memory_space<smem>>
    %185 = vector.broadcast %184 : f32 to vector<8x128xf32>
    %186 = arith.mulf %32, %185 : vector<8x128xf32>
    %187 = arith.addf %183, %186 : vector<8x128xf32>
    %c59 = arith.constant 59 : index
    %188 = memref.load %arg1[%c59] : memref<227xf32, #tpu.memory_space<smem>>
    %189 = vector.broadcast %188 : f32 to vector<8x128xf32>
    %190 = arith.mulf %40, %189 : vector<8x128xf32>
    %191 = arith.addf %187, %190 : vector<8x128xf32>
    %c69 = arith.constant 69 : index
    %192 = memref.load %arg1[%c69] : memref<227xf32, #tpu.memory_space<smem>>
    %193 = vector.broadcast %192 : f32 to vector<8x128xf32>
    %194 = arith.mulf %48, %193 : vector<8x128xf32>
    %195 = arith.addf %191, %194 : vector<8x128xf32>
    %c79 = arith.constant 79 : index
    %196 = memref.load %arg1[%c79] : memref<227xf32, #tpu.memory_space<smem>>
    %197 = vector.broadcast %196 : f32 to vector<8x128xf32>
    %198 = arith.mulf %56, %197 : vector<8x128xf32>
    %199 = arith.addf %195, %198 : vector<8x128xf32>
    %c89 = arith.constant 89 : index
    %200 = memref.load %arg1[%c89] : memref<227xf32, #tpu.memory_space<smem>>
    %201 = vector.broadcast %200 : f32 to vector<8x128xf32>
    %202 = arith.mulf %64, %201 : vector<8x128xf32>
    %203 = arith.addf %199, %202 : vector<8x128xf32>
    %c99 = arith.constant 99 : index
    %204 = memref.load %arg1[%c99] : memref<227xf32, #tpu.memory_space<smem>>
    %205 = vector.broadcast %204 : f32 to vector<8x128xf32>
    %206 = arith.addf %203, %205 : vector<8x128xf32>
    %cst_12 = arith.constant 0.000000e+00 : f32
    %207 = vector.broadcast %cst_12 : f32 to vector<8x128xf32>
    %208 = arith.maximumf %206, %207 : vector<8x128xf32>
    %c20 = arith.constant 20 : index
    %209 = memref.load %arg1[%c20] : memref<227xf32, #tpu.memory_space<smem>>
    %210 = vector.broadcast %209 : f32 to vector<8x128xf32>
    %211 = arith.mulf %8, %210 : vector<8x128xf32>
    %c30 = arith.constant 30 : index
    %212 = memref.load %arg1[%c30] : memref<227xf32, #tpu.memory_space<smem>>
    %213 = vector.broadcast %212 : f32 to vector<8x128xf32>
    %214 = arith.mulf %16, %213 : vector<8x128xf32>
    %215 = arith.addf %211, %214 : vector<8x128xf32>
    %c40 = arith.constant 40 : index
    %216 = memref.load %arg1[%c40] : memref<227xf32, #tpu.memory_space<smem>>
    %217 = vector.broadcast %216 : f32 to vector<8x128xf32>
    %218 = arith.mulf %24, %217 : vector<8x128xf32>
    %219 = arith.addf %215, %218 : vector<8x128xf32>
    %c50 = arith.constant 50 : index
    %220 = memref.load %arg1[%c50] : memref<227xf32, #tpu.memory_space<smem>>
    %221 = vector.broadcast %220 : f32 to vector<8x128xf32>
    %222 = arith.mulf %32, %221 : vector<8x128xf32>
    %223 = arith.addf %219, %222 : vector<8x128xf32>
    %c60 = arith.constant 60 : index
    %224 = memref.load %arg1[%c60] : memref<227xf32, #tpu.memory_space<smem>>
    %225 = vector.broadcast %224 : f32 to vector<8x128xf32>
    %226 = arith.mulf %40, %225 : vector<8x128xf32>
    %227 = arith.addf %223, %226 : vector<8x128xf32>
    %c70 = arith.constant 70 : index
    %228 = memref.load %arg1[%c70] : memref<227xf32, #tpu.memory_space<smem>>
    %229 = vector.broadcast %228 : f32 to vector<8x128xf32>
    %230 = arith.mulf %48, %229 : vector<8x128xf32>
    %231 = arith.addf %227, %230 : vector<8x128xf32>
    %c80 = arith.constant 80 : index
    %232 = memref.load %arg1[%c80] : memref<227xf32, #tpu.memory_space<smem>>
    %233 = vector.broadcast %232 : f32 to vector<8x128xf32>
    %234 = arith.mulf %56, %233 : vector<8x128xf32>
    %235 = arith.addf %231, %234 : vector<8x128xf32>
    %c90 = arith.constant 90 : index
    %236 = memref.load %arg1[%c90] : memref<227xf32, #tpu.memory_space<smem>>
    %237 = vector.broadcast %236 : f32 to vector<8x128xf32>
    %238 = arith.mulf %64, %237 : vector<8x128xf32>
    %239 = arith.addf %235, %238 : vector<8x128xf32>
    %c100 = arith.constant 100 : index
    %240 = memref.load %arg1[%c100] : memref<227xf32, #tpu.memory_space<smem>>
    %241 = vector.broadcast %240 : f32 to vector<8x128xf32>
    %242 = arith.addf %239, %241 : vector<8x128xf32>
    %cst_13 = arith.constant 0.000000e+00 : f32
    %243 = vector.broadcast %cst_13 : f32 to vector<8x128xf32>
    %244 = arith.maximumf %242, %243 : vector<8x128xf32>
    %c21 = arith.constant 21 : index
    %245 = memref.load %arg1[%c21] : memref<227xf32, #tpu.memory_space<smem>>
    %246 = vector.broadcast %245 : f32 to vector<8x128xf32>
    %247 = arith.mulf %8, %246 : vector<8x128xf32>
    %c31 = arith.constant 31 : index
    %248 = memref.load %arg1[%c31] : memref<227xf32, #tpu.memory_space<smem>>
    %249 = vector.broadcast %248 : f32 to vector<8x128xf32>
    %250 = arith.mulf %16, %249 : vector<8x128xf32>
    %251 = arith.addf %247, %250 : vector<8x128xf32>
    %c41 = arith.constant 41 : index
    %252 = memref.load %arg1[%c41] : memref<227xf32, #tpu.memory_space<smem>>
    %253 = vector.broadcast %252 : f32 to vector<8x128xf32>
    %254 = arith.mulf %24, %253 : vector<8x128xf32>
    %255 = arith.addf %251, %254 : vector<8x128xf32>
    %c51 = arith.constant 51 : index
    %256 = memref.load %arg1[%c51] : memref<227xf32, #tpu.memory_space<smem>>
    %257 = vector.broadcast %256 : f32 to vector<8x128xf32>
    %258 = arith.mulf %32, %257 : vector<8x128xf32>
    %259 = arith.addf %255, %258 : vector<8x128xf32>
    %c61 = arith.constant 61 : index
    %260 = memref.load %arg1[%c61] : memref<227xf32, #tpu.memory_space<smem>>
    %261 = vector.broadcast %260 : f32 to vector<8x128xf32>
    %262 = arith.mulf %40, %261 : vector<8x128xf32>
    %263 = arith.addf %259, %262 : vector<8x128xf32>
    %c71 = arith.constant 71 : index
    %264 = memref.load %arg1[%c71] : memref<227xf32, #tpu.memory_space<smem>>
    %265 = vector.broadcast %264 : f32 to vector<8x128xf32>
    %266 = arith.mulf %48, %265 : vector<8x128xf32>
    %267 = arith.addf %263, %266 : vector<8x128xf32>
    %c81 = arith.constant 81 : index
    %268 = memref.load %arg1[%c81] : memref<227xf32, #tpu.memory_space<smem>>
    %269 = vector.broadcast %268 : f32 to vector<8x128xf32>
    %270 = arith.mulf %56, %269 : vector<8x128xf32>
    %271 = arith.addf %267, %270 : vector<8x128xf32>
    %c91 = arith.constant 91 : index
    %272 = memref.load %arg1[%c91] : memref<227xf32, #tpu.memory_space<smem>>
    %273 = vector.broadcast %272 : f32 to vector<8x128xf32>
    %274 = arith.mulf %64, %273 : vector<8x128xf32>
    %275 = arith.addf %271, %274 : vector<8x128xf32>
    %c101 = arith.constant 101 : index
    %276 = memref.load %arg1[%c101] : memref<227xf32, #tpu.memory_space<smem>>
    %277 = vector.broadcast %276 : f32 to vector<8x128xf32>
    %278 = arith.addf %275, %277 : vector<8x128xf32>
    %cst_14 = arith.constant 0.000000e+00 : f32
    %279 = vector.broadcast %cst_14 : f32 to vector<8x128xf32>
    %280 = arith.maximumf %278, %279 : vector<8x128xf32>
    %c22 = arith.constant 22 : index
    %281 = memref.load %arg1[%c22] : memref<227xf32, #tpu.memory_space<smem>>
    %282 = vector.broadcast %281 : f32 to vector<8x128xf32>
    %283 = arith.mulf %8, %282 : vector<8x128xf32>
    %c32 = arith.constant 32 : index
    %284 = memref.load %arg1[%c32] : memref<227xf32, #tpu.memory_space<smem>>
    %285 = vector.broadcast %284 : f32 to vector<8x128xf32>
    %286 = arith.mulf %16, %285 : vector<8x128xf32>
    %287 = arith.addf %283, %286 : vector<8x128xf32>
    %c42 = arith.constant 42 : index
    %288 = memref.load %arg1[%c42] : memref<227xf32, #tpu.memory_space<smem>>
    %289 = vector.broadcast %288 : f32 to vector<8x128xf32>
    %290 = arith.mulf %24, %289 : vector<8x128xf32>
    %291 = arith.addf %287, %290 : vector<8x128xf32>
    %c52 = arith.constant 52 : index
    %292 = memref.load %arg1[%c52] : memref<227xf32, #tpu.memory_space<smem>>
    %293 = vector.broadcast %292 : f32 to vector<8x128xf32>
    %294 = arith.mulf %32, %293 : vector<8x128xf32>
    %295 = arith.addf %291, %294 : vector<8x128xf32>
    %c62 = arith.constant 62 : index
    %296 = memref.load %arg1[%c62] : memref<227xf32, #tpu.memory_space<smem>>
    %297 = vector.broadcast %296 : f32 to vector<8x128xf32>
    %298 = arith.mulf %40, %297 : vector<8x128xf32>
    %299 = arith.addf %295, %298 : vector<8x128xf32>
    %c72 = arith.constant 72 : index
    %300 = memref.load %arg1[%c72] : memref<227xf32, #tpu.memory_space<smem>>
    %301 = vector.broadcast %300 : f32 to vector<8x128xf32>
    %302 = arith.mulf %48, %301 : vector<8x128xf32>
    %303 = arith.addf %299, %302 : vector<8x128xf32>
    %c82 = arith.constant 82 : index
    %304 = memref.load %arg1[%c82] : memref<227xf32, #tpu.memory_space<smem>>
    %305 = vector.broadcast %304 : f32 to vector<8x128xf32>
    %306 = arith.mulf %56, %305 : vector<8x128xf32>
    %307 = arith.addf %303, %306 : vector<8x128xf32>
    %c92 = arith.constant 92 : index
    %308 = memref.load %arg1[%c92] : memref<227xf32, #tpu.memory_space<smem>>
    %309 = vector.broadcast %308 : f32 to vector<8x128xf32>
    %310 = arith.mulf %64, %309 : vector<8x128xf32>
    %311 = arith.addf %307, %310 : vector<8x128xf32>
    %c102 = arith.constant 102 : index
    %312 = memref.load %arg1[%c102] : memref<227xf32, #tpu.memory_space<smem>>
    %313 = vector.broadcast %312 : f32 to vector<8x128xf32>
    %314 = arith.addf %311, %313 : vector<8x128xf32>
    %cst_15 = arith.constant 0.000000e+00 : f32
    %315 = vector.broadcast %cst_15 : f32 to vector<8x128xf32>
    %316 = arith.maximumf %314, %315 : vector<8x128xf32>
    %c23 = arith.constant 23 : index
    %317 = memref.load %arg1[%c23] : memref<227xf32, #tpu.memory_space<smem>>
    %318 = vector.broadcast %317 : f32 to vector<8x128xf32>
    %319 = arith.mulf %8, %318 : vector<8x128xf32>
    %c33 = arith.constant 33 : index
    %320 = memref.load %arg1[%c33] : memref<227xf32, #tpu.memory_space<smem>>
    %321 = vector.broadcast %320 : f32 to vector<8x128xf32>
    %322 = arith.mulf %16, %321 : vector<8x128xf32>
    %323 = arith.addf %319, %322 : vector<8x128xf32>
    %c43 = arith.constant 43 : index
    %324 = memref.load %arg1[%c43] : memref<227xf32, #tpu.memory_space<smem>>
    %325 = vector.broadcast %324 : f32 to vector<8x128xf32>
    %326 = arith.mulf %24, %325 : vector<8x128xf32>
    %327 = arith.addf %323, %326 : vector<8x128xf32>
    %c53 = arith.constant 53 : index
    %328 = memref.load %arg1[%c53] : memref<227xf32, #tpu.memory_space<smem>>
    %329 = vector.broadcast %328 : f32 to vector<8x128xf32>
    %330 = arith.mulf %32, %329 : vector<8x128xf32>
    %331 = arith.addf %327, %330 : vector<8x128xf32>
    %c63 = arith.constant 63 : index
    %332 = memref.load %arg1[%c63] : memref<227xf32, #tpu.memory_space<smem>>
    %333 = vector.broadcast %332 : f32 to vector<8x128xf32>
    %334 = arith.mulf %40, %333 : vector<8x128xf32>
    %335 = arith.addf %331, %334 : vector<8x128xf32>
    %c73 = arith.constant 73 : index
    %336 = memref.load %arg1[%c73] : memref<227xf32, #tpu.memory_space<smem>>
    %337 = vector.broadcast %336 : f32 to vector<8x128xf32>
    %338 = arith.mulf %48, %337 : vector<8x128xf32>
    %339 = arith.addf %335, %338 : vector<8x128xf32>
    %c83 = arith.constant 83 : index
    %340 = memref.load %arg1[%c83] : memref<227xf32, #tpu.memory_space<smem>>
    %341 = vector.broadcast %340 : f32 to vector<8x128xf32>
    %342 = arith.mulf %56, %341 : vector<8x128xf32>
    %343 = arith.addf %339, %342 : vector<8x128xf32>
    %c93 = arith.constant 93 : index
    %344 = memref.load %arg1[%c93] : memref<227xf32, #tpu.memory_space<smem>>
    %345 = vector.broadcast %344 : f32 to vector<8x128xf32>
    %346 = arith.mulf %64, %345 : vector<8x128xf32>
    %347 = arith.addf %343, %346 : vector<8x128xf32>
    %c103 = arith.constant 103 : index
    %348 = memref.load %arg1[%c103] : memref<227xf32, #tpu.memory_space<smem>>
    %349 = vector.broadcast %348 : f32 to vector<8x128xf32>
    %350 = arith.addf %347, %349 : vector<8x128xf32>
    %cst_16 = arith.constant 0.000000e+00 : f32
    %351 = vector.broadcast %cst_16 : f32 to vector<8x128xf32>
    %352 = arith.maximumf %350, %351 : vector<8x128xf32>
    %c24 = arith.constant 24 : index
    %353 = memref.load %arg1[%c24] : memref<227xf32, #tpu.memory_space<smem>>
    %354 = vector.broadcast %353 : f32 to vector<8x128xf32>
    %355 = arith.mulf %8, %354 : vector<8x128xf32>
    %c34 = arith.constant 34 : index
    %356 = memref.load %arg1[%c34] : memref<227xf32, #tpu.memory_space<smem>>
    %357 = vector.broadcast %356 : f32 to vector<8x128xf32>
    %358 = arith.mulf %16, %357 : vector<8x128xf32>
    %359 = arith.addf %355, %358 : vector<8x128xf32>
    %c44 = arith.constant 44 : index
    %360 = memref.load %arg1[%c44] : memref<227xf32, #tpu.memory_space<smem>>
    %361 = vector.broadcast %360 : f32 to vector<8x128xf32>
    %362 = arith.mulf %24, %361 : vector<8x128xf32>
    %363 = arith.addf %359, %362 : vector<8x128xf32>
    %c54 = arith.constant 54 : index
    %364 = memref.load %arg1[%c54] : memref<227xf32, #tpu.memory_space<smem>>
    %365 = vector.broadcast %364 : f32 to vector<8x128xf32>
    %366 = arith.mulf %32, %365 : vector<8x128xf32>
    %367 = arith.addf %363, %366 : vector<8x128xf32>
    %c64 = arith.constant 64 : index
    %368 = memref.load %arg1[%c64] : memref<227xf32, #tpu.memory_space<smem>>
    %369 = vector.broadcast %368 : f32 to vector<8x128xf32>
    %370 = arith.mulf %40, %369 : vector<8x128xf32>
    %371 = arith.addf %367, %370 : vector<8x128xf32>
    %c74 = arith.constant 74 : index
    %372 = memref.load %arg1[%c74] : memref<227xf32, #tpu.memory_space<smem>>
    %373 = vector.broadcast %372 : f32 to vector<8x128xf32>
    %374 = arith.mulf %48, %373 : vector<8x128xf32>
    %375 = arith.addf %371, %374 : vector<8x128xf32>
    %c84 = arith.constant 84 : index
    %376 = memref.load %arg1[%c84] : memref<227xf32, #tpu.memory_space<smem>>
    %377 = vector.broadcast %376 : f32 to vector<8x128xf32>
    %378 = arith.mulf %56, %377 : vector<8x128xf32>
    %379 = arith.addf %375, %378 : vector<8x128xf32>
    %c94 = arith.constant 94 : index
    %380 = memref.load %arg1[%c94] : memref<227xf32, #tpu.memory_space<smem>>
    %381 = vector.broadcast %380 : f32 to vector<8x128xf32>
    %382 = arith.mulf %64, %381 : vector<8x128xf32>
    %383 = arith.addf %379, %382 : vector<8x128xf32>
    %c104 = arith.constant 104 : index
    %384 = memref.load %arg1[%c104] : memref<227xf32, #tpu.memory_space<smem>>
    %385 = vector.broadcast %384 : f32 to vector<8x128xf32>
    %386 = arith.addf %383, %385 : vector<8x128xf32>
    %cst_17 = arith.constant 0.000000e+00 : f32
    %387 = vector.broadcast %cst_17 : f32 to vector<8x128xf32>
    %388 = arith.maximumf %386, %387 : vector<8x128xf32>
    %c25 = arith.constant 25 : index
    %389 = memref.load %arg1[%c25] : memref<227xf32, #tpu.memory_space<smem>>
    %390 = vector.broadcast %389 : f32 to vector<8x128xf32>
    %391 = arith.mulf %8, %390 : vector<8x128xf32>
    %c35 = arith.constant 35 : index
    %392 = memref.load %arg1[%c35] : memref<227xf32, #tpu.memory_space<smem>>
    %393 = vector.broadcast %392 : f32 to vector<8x128xf32>
    %394 = arith.mulf %16, %393 : vector<8x128xf32>
    %395 = arith.addf %391, %394 : vector<8x128xf32>
    %c45 = arith.constant 45 : index
    %396 = memref.load %arg1[%c45] : memref<227xf32, #tpu.memory_space<smem>>
    %397 = vector.broadcast %396 : f32 to vector<8x128xf32>
    %398 = arith.mulf %24, %397 : vector<8x128xf32>
    %399 = arith.addf %395, %398 : vector<8x128xf32>
    %c55 = arith.constant 55 : index
    %400 = memref.load %arg1[%c55] : memref<227xf32, #tpu.memory_space<smem>>
    %401 = vector.broadcast %400 : f32 to vector<8x128xf32>
    %402 = arith.mulf %32, %401 : vector<8x128xf32>
    %403 = arith.addf %399, %402 : vector<8x128xf32>
    %c65 = arith.constant 65 : index
    %404 = memref.load %arg1[%c65] : memref<227xf32, #tpu.memory_space<smem>>
    %405 = vector.broadcast %404 : f32 to vector<8x128xf32>
    %406 = arith.mulf %40, %405 : vector<8x128xf32>
    %407 = arith.addf %403, %406 : vector<8x128xf32>
    %c75 = arith.constant 75 : index
    %408 = memref.load %arg1[%c75] : memref<227xf32, #tpu.memory_space<smem>>
    %409 = vector.broadcast %408 : f32 to vector<8x128xf32>
    %410 = arith.mulf %48, %409 : vector<8x128xf32>
    %411 = arith.addf %407, %410 : vector<8x128xf32>
    %c85 = arith.constant 85 : index
    %412 = memref.load %arg1[%c85] : memref<227xf32, #tpu.memory_space<smem>>
    %413 = vector.broadcast %412 : f32 to vector<8x128xf32>
    %414 = arith.mulf %56, %413 : vector<8x128xf32>
    %415 = arith.addf %411, %414 : vector<8x128xf32>
    %c95 = arith.constant 95 : index
    %416 = memref.load %arg1[%c95] : memref<227xf32, #tpu.memory_space<smem>>
    %417 = vector.broadcast %416 : f32 to vector<8x128xf32>
    %418 = arith.mulf %64, %417 : vector<8x128xf32>
    %419 = arith.addf %415, %418 : vector<8x128xf32>
    %c105 = arith.constant 105 : index
    %420 = memref.load %arg1[%c105] : memref<227xf32, #tpu.memory_space<smem>>
    %421 = vector.broadcast %420 : f32 to vector<8x128xf32>
    %422 = arith.addf %419, %421 : vector<8x128xf32>
    %cst_18 = arith.constant 0.000000e+00 : f32
    %423 = vector.broadcast %cst_18 : f32 to vector<8x128xf32>
    %424 = arith.maximumf %422, %423 : vector<8x128xf32>
    %c106 = arith.constant 106 : index
    %425 = memref.load %arg1[%c106] : memref<227xf32, #tpu.memory_space<smem>>
    %426 = vector.broadcast %425 : f32 to vector<8x128xf32>
    %427 = arith.mulf %100, %426 : vector<8x128xf32>
    %c116 = arith.constant 116 : index
    %428 = memref.load %arg1[%c116] : memref<227xf32, #tpu.memory_space<smem>>
    %429 = vector.broadcast %428 : f32 to vector<8x128xf32>
    %430 = arith.mulf %136, %429 : vector<8x128xf32>
    %431 = arith.addf %427, %430 : vector<8x128xf32>
    %c126 = arith.constant 126 : index
    %432 = memref.load %arg1[%c126] : memref<227xf32, #tpu.memory_space<smem>>
    %433 = vector.broadcast %432 : f32 to vector<8x128xf32>
    %434 = arith.mulf %172, %433 : vector<8x128xf32>
    %435 = arith.addf %431, %434 : vector<8x128xf32>
    %c136 = arith.constant 136 : index
    %436 = memref.load %arg1[%c136] : memref<227xf32, #tpu.memory_space<smem>>
    %437 = vector.broadcast %436 : f32 to vector<8x128xf32>
    %438 = arith.mulf %208, %437 : vector<8x128xf32>
    %439 = arith.addf %435, %438 : vector<8x128xf32>
    %c146 = arith.constant 146 : index
    %440 = memref.load %arg1[%c146] : memref<227xf32, #tpu.memory_space<smem>>
    %441 = vector.broadcast %440 : f32 to vector<8x128xf32>
    %442 = arith.mulf %244, %441 : vector<8x128xf32>
    %443 = arith.addf %439, %442 : vector<8x128xf32>
    %c156 = arith.constant 156 : index
    %444 = memref.load %arg1[%c156] : memref<227xf32, #tpu.memory_space<smem>>
    %445 = vector.broadcast %444 : f32 to vector<8x128xf32>
    %446 = arith.mulf %280, %445 : vector<8x128xf32>
    %447 = arith.addf %443, %446 : vector<8x128xf32>
    %c166 = arith.constant 166 : index
    %448 = memref.load %arg1[%c166] : memref<227xf32, #tpu.memory_space<smem>>
    %449 = vector.broadcast %448 : f32 to vector<8x128xf32>
    %450 = arith.mulf %316, %449 : vector<8x128xf32>
    %451 = arith.addf %447, %450 : vector<8x128xf32>
    %c176 = arith.constant 176 : index
    %452 = memref.load %arg1[%c176] : memref<227xf32, #tpu.memory_space<smem>>
    %453 = vector.broadcast %452 : f32 to vector<8x128xf32>
    %454 = arith.mulf %352, %453 : vector<8x128xf32>
    %455 = arith.addf %451, %454 : vector<8x128xf32>
    %c186 = arith.constant 186 : index
    %456 = memref.load %arg1[%c186] : memref<227xf32, #tpu.memory_space<smem>>
    %457 = vector.broadcast %456 : f32 to vector<8x128xf32>
    %458 = arith.mulf %388, %457 : vector<8x128xf32>
    %459 = arith.addf %455, %458 : vector<8x128xf32>
    %c196 = arith.constant 196 : index
    %460 = memref.load %arg1[%c196] : memref<227xf32, #tpu.memory_space<smem>>
    %461 = vector.broadcast %460 : f32 to vector<8x128xf32>
    %462 = arith.mulf %424, %461 : vector<8x128xf32>
    %463 = arith.addf %459, %462 : vector<8x128xf32>
    %c206 = arith.constant 206 : index
    %464 = memref.load %arg1[%c206] : memref<227xf32, #tpu.memory_space<smem>>
    %465 = vector.broadcast %464 : f32 to vector<8x128xf32>
    %466 = arith.addf %463, %465 : vector<8x128xf32>
    %cst_19 = arith.constant 0.000000e+00 : f32
    %467 = vector.broadcast %cst_19 : f32 to vector<8x128xf32>
    %468 = arith.maximumf %466, %467 : vector<8x128xf32>
    %c107 = arith.constant 107 : index
    %469 = memref.load %arg1[%c107] : memref<227xf32, #tpu.memory_space<smem>>
    %470 = vector.broadcast %469 : f32 to vector<8x128xf32>
    %471 = arith.mulf %100, %470 : vector<8x128xf32>
    %c117 = arith.constant 117 : index
    %472 = memref.load %arg1[%c117] : memref<227xf32, #tpu.memory_space<smem>>
    %473 = vector.broadcast %472 : f32 to vector<8x128xf32>
    %474 = arith.mulf %136, %473 : vector<8x128xf32>
    %475 = arith.addf %471, %474 : vector<8x128xf32>
    %c127 = arith.constant 127 : index
    %476 = memref.load %arg1[%c127] : memref<227xf32, #tpu.memory_space<smem>>
    %477 = vector.broadcast %476 : f32 to vector<8x128xf32>
    %478 = arith.mulf %172, %477 : vector<8x128xf32>
    %479 = arith.addf %475, %478 : vector<8x128xf32>
    %c137 = arith.constant 137 : index
    %480 = memref.load %arg1[%c137] : memref<227xf32, #tpu.memory_space<smem>>
    %481 = vector.broadcast %480 : f32 to vector<8x128xf32>
    %482 = arith.mulf %208, %481 : vector<8x128xf32>
    %483 = arith.addf %479, %482 : vector<8x128xf32>
    %c147 = arith.constant 147 : index
    %484 = memref.load %arg1[%c147] : memref<227xf32, #tpu.memory_space<smem>>
    %485 = vector.broadcast %484 : f32 to vector<8x128xf32>
    %486 = arith.mulf %244, %485 : vector<8x128xf32>
    %487 = arith.addf %483, %486 : vector<8x128xf32>
    %c157 = arith.constant 157 : index
    %488 = memref.load %arg1[%c157] : memref<227xf32, #tpu.memory_space<smem>>
    %489 = vector.broadcast %488 : f32 to vector<8x128xf32>
    %490 = arith.mulf %280, %489 : vector<8x128xf32>
    %491 = arith.addf %487, %490 : vector<8x128xf32>
    %c167 = arith.constant 167 : index
    %492 = memref.load %arg1[%c167] : memref<227xf32, #tpu.memory_space<smem>>
    %493 = vector.broadcast %492 : f32 to vector<8x128xf32>
    %494 = arith.mulf %316, %493 : vector<8x128xf32>
    %495 = arith.addf %491, %494 : vector<8x128xf32>
    %c177 = arith.constant 177 : index
    %496 = memref.load %arg1[%c177] : memref<227xf32, #tpu.memory_space<smem>>
    %497 = vector.broadcast %496 : f32 to vector<8x128xf32>
    %498 = arith.mulf %352, %497 : vector<8x128xf32>
    %499 = arith.addf %495, %498 : vector<8x128xf32>
    %c187 = arith.constant 187 : index
    %500 = memref.load %arg1[%c187] : memref<227xf32, #tpu.memory_space<smem>>
    %501 = vector.broadcast %500 : f32 to vector<8x128xf32>
    %502 = arith.mulf %388, %501 : vector<8x128xf32>
    %503 = arith.addf %499, %502 : vector<8x128xf32>
    %c197 = arith.constant 197 : index
    %504 = memref.load %arg1[%c197] : memref<227xf32, #tpu.memory_space<smem>>
    %505 = vector.broadcast %504 : f32 to vector<8x128xf32>
    %506 = arith.mulf %424, %505 : vector<8x128xf32>
    %507 = arith.addf %503, %506 : vector<8x128xf32>
    %c207 = arith.constant 207 : index
    %508 = memref.load %arg1[%c207] : memref<227xf32, #tpu.memory_space<smem>>
    %509 = vector.broadcast %508 : f32 to vector<8x128xf32>
    %510 = arith.addf %507, %509 : vector<8x128xf32>
    %cst_20 = arith.constant 0.000000e+00 : f32
    %511 = vector.broadcast %cst_20 : f32 to vector<8x128xf32>
    %512 = arith.maximumf %510, %511 : vector<8x128xf32>
    %c108 = arith.constant 108 : index
    %513 = memref.load %arg1[%c108] : memref<227xf32, #tpu.memory_space<smem>>
    %514 = vector.broadcast %513 : f32 to vector<8x128xf32>
    %515 = arith.mulf %100, %514 : vector<8x128xf32>
    %c118 = arith.constant 118 : index
    %516 = memref.load %arg1[%c118] : memref<227xf32, #tpu.memory_space<smem>>
    %517 = vector.broadcast %516 : f32 to vector<8x128xf32>
    %518 = arith.mulf %136, %517 : vector<8x128xf32>
    %519 = arith.addf %515, %518 : vector<8x128xf32>
    %c128 = arith.constant 128 : index
    %520 = memref.load %arg1[%c128] : memref<227xf32, #tpu.memory_space<smem>>
    %521 = vector.broadcast %520 : f32 to vector<8x128xf32>
    %522 = arith.mulf %172, %521 : vector<8x128xf32>
    %523 = arith.addf %519, %522 : vector<8x128xf32>
    %c138 = arith.constant 138 : index
    %524 = memref.load %arg1[%c138] : memref<227xf32, #tpu.memory_space<smem>>
    %525 = vector.broadcast %524 : f32 to vector<8x128xf32>
    %526 = arith.mulf %208, %525 : vector<8x128xf32>
    %527 = arith.addf %523, %526 : vector<8x128xf32>
    %c148 = arith.constant 148 : index
    %528 = memref.load %arg1[%c148] : memref<227xf32, #tpu.memory_space<smem>>
    %529 = vector.broadcast %528 : f32 to vector<8x128xf32>
    %530 = arith.mulf %244, %529 : vector<8x128xf32>
    %531 = arith.addf %527, %530 : vector<8x128xf32>
    %c158 = arith.constant 158 : index
    %532 = memref.load %arg1[%c158] : memref<227xf32, #tpu.memory_space<smem>>
    %533 = vector.broadcast %532 : f32 to vector<8x128xf32>
    %534 = arith.mulf %280, %533 : vector<8x128xf32>
    %535 = arith.addf %531, %534 : vector<8x128xf32>
    %c168 = arith.constant 168 : index
    %536 = memref.load %arg1[%c168] : memref<227xf32, #tpu.memory_space<smem>>
    %537 = vector.broadcast %536 : f32 to vector<8x128xf32>
    %538 = arith.mulf %316, %537 : vector<8x128xf32>
    %539 = arith.addf %535, %538 : vector<8x128xf32>
    %c178 = arith.constant 178 : index
    %540 = memref.load %arg1[%c178] : memref<227xf32, #tpu.memory_space<smem>>
    %541 = vector.broadcast %540 : f32 to vector<8x128xf32>
    %542 = arith.mulf %352, %541 : vector<8x128xf32>
    %543 = arith.addf %539, %542 : vector<8x128xf32>
    %c188 = arith.constant 188 : index
    %544 = memref.load %arg1[%c188] : memref<227xf32, #tpu.memory_space<smem>>
    %545 = vector.broadcast %544 : f32 to vector<8x128xf32>
    %546 = arith.mulf %388, %545 : vector<8x128xf32>
    %547 = arith.addf %543, %546 : vector<8x128xf32>
    %c198 = arith.constant 198 : index
    %548 = memref.load %arg1[%c198] : memref<227xf32, #tpu.memory_space<smem>>
    %549 = vector.broadcast %548 : f32 to vector<8x128xf32>
    %550 = arith.mulf %424, %549 : vector<8x128xf32>
    %551 = arith.addf %547, %550 : vector<8x128xf32>
    %c208 = arith.constant 208 : index
    %552 = memref.load %arg1[%c208] : memref<227xf32, #tpu.memory_space<smem>>
    %553 = vector.broadcast %552 : f32 to vector<8x128xf32>
    %554 = arith.addf %551, %553 : vector<8x128xf32>
    %cst_21 = arith.constant 0.000000e+00 : f32
    %555 = vector.broadcast %cst_21 : f32 to vector<8x128xf32>
    %556 = arith.maximumf %554, %555 : vector<8x128xf32>
    %c109 = arith.constant 109 : index
    %557 = memref.load %arg1[%c109] : memref<227xf32, #tpu.memory_space<smem>>
    %558 = vector.broadcast %557 : f32 to vector<8x128xf32>
    %559 = arith.mulf %100, %558 : vector<8x128xf32>
    %c119 = arith.constant 119 : index
    %560 = memref.load %arg1[%c119] : memref<227xf32, #tpu.memory_space<smem>>
    %561 = vector.broadcast %560 : f32 to vector<8x128xf32>
    %562 = arith.mulf %136, %561 : vector<8x128xf32>
    %563 = arith.addf %559, %562 : vector<8x128xf32>
    %c129 = arith.constant 129 : index
    %564 = memref.load %arg1[%c129] : memref<227xf32, #tpu.memory_space<smem>>
    %565 = vector.broadcast %564 : f32 to vector<8x128xf32>
    %566 = arith.mulf %172, %565 : vector<8x128xf32>
    %567 = arith.addf %563, %566 : vector<8x128xf32>
    %c139 = arith.constant 139 : index
    %568 = memref.load %arg1[%c139] : memref<227xf32, #tpu.memory_space<smem>>
    %569 = vector.broadcast %568 : f32 to vector<8x128xf32>
    %570 = arith.mulf %208, %569 : vector<8x128xf32>
    %571 = arith.addf %567, %570 : vector<8x128xf32>
    %c149 = arith.constant 149 : index
    %572 = memref.load %arg1[%c149] : memref<227xf32, #tpu.memory_space<smem>>
    %573 = vector.broadcast %572 : f32 to vector<8x128xf32>
    %574 = arith.mulf %244, %573 : vector<8x128xf32>
    %575 = arith.addf %571, %574 : vector<8x128xf32>
    %c159 = arith.constant 159 : index
    %576 = memref.load %arg1[%c159] : memref<227xf32, #tpu.memory_space<smem>>
    %577 = vector.broadcast %576 : f32 to vector<8x128xf32>
    %578 = arith.mulf %280, %577 : vector<8x128xf32>
    %579 = arith.addf %575, %578 : vector<8x128xf32>
    %c169 = arith.constant 169 : index
    %580 = memref.load %arg1[%c169] : memref<227xf32, #tpu.memory_space<smem>>
    %581 = vector.broadcast %580 : f32 to vector<8x128xf32>
    %582 = arith.mulf %316, %581 : vector<8x128xf32>
    %583 = arith.addf %579, %582 : vector<8x128xf32>
    %c179 = arith.constant 179 : index
    %584 = memref.load %arg1[%c179] : memref<227xf32, #tpu.memory_space<smem>>
    %585 = vector.broadcast %584 : f32 to vector<8x128xf32>
    %586 = arith.mulf %352, %585 : vector<8x128xf32>
    %587 = arith.addf %583, %586 : vector<8x128xf32>
    %c189 = arith.constant 189 : index
    %588 = memref.load %arg1[%c189] : memref<227xf32, #tpu.memory_space<smem>>
    %589 = vector.broadcast %588 : f32 to vector<8x128xf32>
    %590 = arith.mulf %388, %589 : vector<8x128xf32>
    %591 = arith.addf %587, %590 : vector<8x128xf32>
    %c199 = arith.constant 199 : index
    %592 = memref.load %arg1[%c199] : memref<227xf32, #tpu.memory_space<smem>>
    %593 = vector.broadcast %592 : f32 to vector<8x128xf32>
    %594 = arith.mulf %424, %593 : vector<8x128xf32>
    %595 = arith.addf %591, %594 : vector<8x128xf32>
    %c209 = arith.constant 209 : index
    %596 = memref.load %arg1[%c209] : memref<227xf32, #tpu.memory_space<smem>>
    %597 = vector.broadcast %596 : f32 to vector<8x128xf32>
    %598 = arith.addf %595, %597 : vector<8x128xf32>
    %cst_22 = arith.constant 0.000000e+00 : f32
    %599 = vector.broadcast %cst_22 : f32 to vector<8x128xf32>
    %600 = arith.maximumf %598, %599 : vector<8x128xf32>
    %c110 = arith.constant 110 : index
    %601 = memref.load %arg1[%c110] : memref<227xf32, #tpu.memory_space<smem>>
    %602 = vector.broadcast %601 : f32 to vector<8x128xf32>
    %603 = arith.mulf %100, %602 : vector<8x128xf32>
    %c120 = arith.constant 120 : index
    %604 = memref.load %arg1[%c120] : memref<227xf32, #tpu.memory_space<smem>>
    %605 = vector.broadcast %604 : f32 to vector<8x128xf32>
    %606 = arith.mulf %136, %605 : vector<8x128xf32>
    %607 = arith.addf %603, %606 : vector<8x128xf32>
    %c130 = arith.constant 130 : index
    %608 = memref.load %arg1[%c130] : memref<227xf32, #tpu.memory_space<smem>>
    %609 = vector.broadcast %608 : f32 to vector<8x128xf32>
    %610 = arith.mulf %172, %609 : vector<8x128xf32>
    %611 = arith.addf %607, %610 : vector<8x128xf32>
    %c140 = arith.constant 140 : index
    %612 = memref.load %arg1[%c140] : memref<227xf32, #tpu.memory_space<smem>>
    %613 = vector.broadcast %612 : f32 to vector<8x128xf32>
    %614 = arith.mulf %208, %613 : vector<8x128xf32>
    %615 = arith.addf %611, %614 : vector<8x128xf32>
    %c150 = arith.constant 150 : index
    %616 = memref.load %arg1[%c150] : memref<227xf32, #tpu.memory_space<smem>>
    %617 = vector.broadcast %616 : f32 to vector<8x128xf32>
    %618 = arith.mulf %244, %617 : vector<8x128xf32>
    %619 = arith.addf %615, %618 : vector<8x128xf32>
    %c160 = arith.constant 160 : index
    %620 = memref.load %arg1[%c160] : memref<227xf32, #tpu.memory_space<smem>>
    %621 = vector.broadcast %620 : f32 to vector<8x128xf32>
    %622 = arith.mulf %280, %621 : vector<8x128xf32>
    %623 = arith.addf %619, %622 : vector<8x128xf32>
    %c170 = arith.constant 170 : index
    %624 = memref.load %arg1[%c170] : memref<227xf32, #tpu.memory_space<smem>>
    %625 = vector.broadcast %624 : f32 to vector<8x128xf32>
    %626 = arith.mulf %316, %625 : vector<8x128xf32>
    %627 = arith.addf %623, %626 : vector<8x128xf32>
    %c180 = arith.constant 180 : index
    %628 = memref.load %arg1[%c180] : memref<227xf32, #tpu.memory_space<smem>>
    %629 = vector.broadcast %628 : f32 to vector<8x128xf32>
    %630 = arith.mulf %352, %629 : vector<8x128xf32>
    %631 = arith.addf %627, %630 : vector<8x128xf32>
    %c190 = arith.constant 190 : index
    %632 = memref.load %arg1[%c190] : memref<227xf32, #tpu.memory_space<smem>>
    %633 = vector.broadcast %632 : f32 to vector<8x128xf32>
    %634 = arith.mulf %388, %633 : vector<8x128xf32>
    %635 = arith.addf %631, %634 : vector<8x128xf32>
    %c200 = arith.constant 200 : index
    %636 = memref.load %arg1[%c200] : memref<227xf32, #tpu.memory_space<smem>>
    %637 = vector.broadcast %636 : f32 to vector<8x128xf32>
    %638 = arith.mulf %424, %637 : vector<8x128xf32>
    %639 = arith.addf %635, %638 : vector<8x128xf32>
    %c210 = arith.constant 210 : index
    %640 = memref.load %arg1[%c210] : memref<227xf32, #tpu.memory_space<smem>>
    %641 = vector.broadcast %640 : f32 to vector<8x128xf32>
    %642 = arith.addf %639, %641 : vector<8x128xf32>
    %cst_23 = arith.constant 0.000000e+00 : f32
    %643 = vector.broadcast %cst_23 : f32 to vector<8x128xf32>
    %644 = arith.maximumf %642, %643 : vector<8x128xf32>
    %c111 = arith.constant 111 : index
    %645 = memref.load %arg1[%c111] : memref<227xf32, #tpu.memory_space<smem>>
    %646 = vector.broadcast %645 : f32 to vector<8x128xf32>
    %647 = arith.mulf %100, %646 : vector<8x128xf32>
    %c121 = arith.constant 121 : index
    %648 = memref.load %arg1[%c121] : memref<227xf32, #tpu.memory_space<smem>>
    %649 = vector.broadcast %648 : f32 to vector<8x128xf32>
    %650 = arith.mulf %136, %649 : vector<8x128xf32>
    %651 = arith.addf %647, %650 : vector<8x128xf32>
    %c131 = arith.constant 131 : index
    %652 = memref.load %arg1[%c131] : memref<227xf32, #tpu.memory_space<smem>>
    %653 = vector.broadcast %652 : f32 to vector<8x128xf32>
    %654 = arith.mulf %172, %653 : vector<8x128xf32>
    %655 = arith.addf %651, %654 : vector<8x128xf32>
    %c141 = arith.constant 141 : index
    %656 = memref.load %arg1[%c141] : memref<227xf32, #tpu.memory_space<smem>>
    %657 = vector.broadcast %656 : f32 to vector<8x128xf32>
    %658 = arith.mulf %208, %657 : vector<8x128xf32>
    %659 = arith.addf %655, %658 : vector<8x128xf32>
    %c151 = arith.constant 151 : index
    %660 = memref.load %arg1[%c151] : memref<227xf32, #tpu.memory_space<smem>>
    %661 = vector.broadcast %660 : f32 to vector<8x128xf32>
    %662 = arith.mulf %244, %661 : vector<8x128xf32>
    %663 = arith.addf %659, %662 : vector<8x128xf32>
    %c161 = arith.constant 161 : index
    %664 = memref.load %arg1[%c161] : memref<227xf32, #tpu.memory_space<smem>>
    %665 = vector.broadcast %664 : f32 to vector<8x128xf32>
    %666 = arith.mulf %280, %665 : vector<8x128xf32>
    %667 = arith.addf %663, %666 : vector<8x128xf32>
    %c171 = arith.constant 171 : index
    %668 = memref.load %arg1[%c171] : memref<227xf32, #tpu.memory_space<smem>>
    %669 = vector.broadcast %668 : f32 to vector<8x128xf32>
    %670 = arith.mulf %316, %669 : vector<8x128xf32>
    %671 = arith.addf %667, %670 : vector<8x128xf32>
    %c181 = arith.constant 181 : index
    %672 = memref.load %arg1[%c181] : memref<227xf32, #tpu.memory_space<smem>>
    %673 = vector.broadcast %672 : f32 to vector<8x128xf32>
    %674 = arith.mulf %352, %673 : vector<8x128xf32>
    %675 = arith.addf %671, %674 : vector<8x128xf32>
    %c191 = arith.constant 191 : index
    %676 = memref.load %arg1[%c191] : memref<227xf32, #tpu.memory_space<smem>>
    %677 = vector.broadcast %676 : f32 to vector<8x128xf32>
    %678 = arith.mulf %388, %677 : vector<8x128xf32>
    %679 = arith.addf %675, %678 : vector<8x128xf32>
    %c201 = arith.constant 201 : index
    %680 = memref.load %arg1[%c201] : memref<227xf32, #tpu.memory_space<smem>>
    %681 = vector.broadcast %680 : f32 to vector<8x128xf32>
    %682 = arith.mulf %424, %681 : vector<8x128xf32>
    %683 = arith.addf %679, %682 : vector<8x128xf32>
    %c211 = arith.constant 211 : index
    %684 = memref.load %arg1[%c211] : memref<227xf32, #tpu.memory_space<smem>>
    %685 = vector.broadcast %684 : f32 to vector<8x128xf32>
    %686 = arith.addf %683, %685 : vector<8x128xf32>
    %cst_24 = arith.constant 0.000000e+00 : f32
    %687 = vector.broadcast %cst_24 : f32 to vector<8x128xf32>
    %688 = arith.maximumf %686, %687 : vector<8x128xf32>
    %c112 = arith.constant 112 : index
    %689 = memref.load %arg1[%c112] : memref<227xf32, #tpu.memory_space<smem>>
    %690 = vector.broadcast %689 : f32 to vector<8x128xf32>
    %691 = arith.mulf %100, %690 : vector<8x128xf32>
    %c122 = arith.constant 122 : index
    %692 = memref.load %arg1[%c122] : memref<227xf32, #tpu.memory_space<smem>>
    %693 = vector.broadcast %692 : f32 to vector<8x128xf32>
    %694 = arith.mulf %136, %693 : vector<8x128xf32>
    %695 = arith.addf %691, %694 : vector<8x128xf32>
    %c132 = arith.constant 132 : index
    %696 = memref.load %arg1[%c132] : memref<227xf32, #tpu.memory_space<smem>>
    %697 = vector.broadcast %696 : f32 to vector<8x128xf32>
    %698 = arith.mulf %172, %697 : vector<8x128xf32>
    %699 = arith.addf %695, %698 : vector<8x128xf32>
    %c142 = arith.constant 142 : index
    %700 = memref.load %arg1[%c142] : memref<227xf32, #tpu.memory_space<smem>>
    %701 = vector.broadcast %700 : f32 to vector<8x128xf32>
    %702 = arith.mulf %208, %701 : vector<8x128xf32>
    %703 = arith.addf %699, %702 : vector<8x128xf32>
    %c152 = arith.constant 152 : index
    %704 = memref.load %arg1[%c152] : memref<227xf32, #tpu.memory_space<smem>>
    %705 = vector.broadcast %704 : f32 to vector<8x128xf32>
    %706 = arith.mulf %244, %705 : vector<8x128xf32>
    %707 = arith.addf %703, %706 : vector<8x128xf32>
    %c162 = arith.constant 162 : index
    %708 = memref.load %arg1[%c162] : memref<227xf32, #tpu.memory_space<smem>>
    %709 = vector.broadcast %708 : f32 to vector<8x128xf32>
    %710 = arith.mulf %280, %709 : vector<8x128xf32>
    %711 = arith.addf %707, %710 : vector<8x128xf32>
    %c172 = arith.constant 172 : index
    %712 = memref.load %arg1[%c172] : memref<227xf32, #tpu.memory_space<smem>>
    %713 = vector.broadcast %712 : f32 to vector<8x128xf32>
    %714 = arith.mulf %316, %713 : vector<8x128xf32>
    %715 = arith.addf %711, %714 : vector<8x128xf32>
    %c182 = arith.constant 182 : index
    %716 = memref.load %arg1[%c182] : memref<227xf32, #tpu.memory_space<smem>>
    %717 = vector.broadcast %716 : f32 to vector<8x128xf32>
    %718 = arith.mulf %352, %717 : vector<8x128xf32>
    %719 = arith.addf %715, %718 : vector<8x128xf32>
    %c192 = arith.constant 192 : index
    %720 = memref.load %arg1[%c192] : memref<227xf32, #tpu.memory_space<smem>>
    %721 = vector.broadcast %720 : f32 to vector<8x128xf32>
    %722 = arith.mulf %388, %721 : vector<8x128xf32>
    %723 = arith.addf %719, %722 : vector<8x128xf32>
    %c202 = arith.constant 202 : index
    %724 = memref.load %arg1[%c202] : memref<227xf32, #tpu.memory_space<smem>>
    %725 = vector.broadcast %724 : f32 to vector<8x128xf32>
    %726 = arith.mulf %424, %725 : vector<8x128xf32>
    %727 = arith.addf %723, %726 : vector<8x128xf32>
    %c212 = arith.constant 212 : index
    %728 = memref.load %arg1[%c212] : memref<227xf32, #tpu.memory_space<smem>>
    %729 = vector.broadcast %728 : f32 to vector<8x128xf32>
    %730 = arith.addf %727, %729 : vector<8x128xf32>
    %cst_25 = arith.constant 0.000000e+00 : f32
    %731 = vector.broadcast %cst_25 : f32 to vector<8x128xf32>
    %732 = arith.maximumf %730, %731 : vector<8x128xf32>
    %c113 = arith.constant 113 : index
    %733 = memref.load %arg1[%c113] : memref<227xf32, #tpu.memory_space<smem>>
    %734 = vector.broadcast %733 : f32 to vector<8x128xf32>
    %735 = arith.mulf %100, %734 : vector<8x128xf32>
    %c123 = arith.constant 123 : index
    %736 = memref.load %arg1[%c123] : memref<227xf32, #tpu.memory_space<smem>>
    %737 = vector.broadcast %736 : f32 to vector<8x128xf32>
    %738 = arith.mulf %136, %737 : vector<8x128xf32>
    %739 = arith.addf %735, %738 : vector<8x128xf32>
    %c133 = arith.constant 133 : index
    %740 = memref.load %arg1[%c133] : memref<227xf32, #tpu.memory_space<smem>>
    %741 = vector.broadcast %740 : f32 to vector<8x128xf32>
    %742 = arith.mulf %172, %741 : vector<8x128xf32>
    %743 = arith.addf %739, %742 : vector<8x128xf32>
    %c143 = arith.constant 143 : index
    %744 = memref.load %arg1[%c143] : memref<227xf32, #tpu.memory_space<smem>>
    %745 = vector.broadcast %744 : f32 to vector<8x128xf32>
    %746 = arith.mulf %208, %745 : vector<8x128xf32>
    %747 = arith.addf %743, %746 : vector<8x128xf32>
    %c153 = arith.constant 153 : index
    %748 = memref.load %arg1[%c153] : memref<227xf32, #tpu.memory_space<smem>>
    %749 = vector.broadcast %748 : f32 to vector<8x128xf32>
    %750 = arith.mulf %244, %749 : vector<8x128xf32>
    %751 = arith.addf %747, %750 : vector<8x128xf32>
    %c163 = arith.constant 163 : index
    %752 = memref.load %arg1[%c163] : memref<227xf32, #tpu.memory_space<smem>>
    %753 = vector.broadcast %752 : f32 to vector<8x128xf32>
    %754 = arith.mulf %280, %753 : vector<8x128xf32>
    %755 = arith.addf %751, %754 : vector<8x128xf32>
    %c173 = arith.constant 173 : index
    %756 = memref.load %arg1[%c173] : memref<227xf32, #tpu.memory_space<smem>>
    %757 = vector.broadcast %756 : f32 to vector<8x128xf32>
    %758 = arith.mulf %316, %757 : vector<8x128xf32>
    %759 = arith.addf %755, %758 : vector<8x128xf32>
    %c183 = arith.constant 183 : index
    %760 = memref.load %arg1[%c183] : memref<227xf32, #tpu.memory_space<smem>>
    %761 = vector.broadcast %760 : f32 to vector<8x128xf32>
    %762 = arith.mulf %352, %761 : vector<8x128xf32>
    %763 = arith.addf %759, %762 : vector<8x128xf32>
    %c193 = arith.constant 193 : index
    %764 = memref.load %arg1[%c193] : memref<227xf32, #tpu.memory_space<smem>>
    %765 = vector.broadcast %764 : f32 to vector<8x128xf32>
    %766 = arith.mulf %388, %765 : vector<8x128xf32>
    %767 = arith.addf %763, %766 : vector<8x128xf32>
    %c203 = arith.constant 203 : index
    %768 = memref.load %arg1[%c203] : memref<227xf32, #tpu.memory_space<smem>>
    %769 = vector.broadcast %768 : f32 to vector<8x128xf32>
    %770 = arith.mulf %424, %769 : vector<8x128xf32>
    %771 = arith.addf %767, %770 : vector<8x128xf32>
    %c213 = arith.constant 213 : index
    %772 = memref.load %arg1[%c213] : memref<227xf32, #tpu.memory_space<smem>>
    %773 = vector.broadcast %772 : f32 to vector<8x128xf32>
    %774 = arith.addf %771, %773 : vector<8x128xf32>
    %cst_26 = arith.constant 0.000000e+00 : f32
    %775 = vector.broadcast %cst_26 : f32 to vector<8x128xf32>
    %776 = arith.maximumf %774, %775 : vector<8x128xf32>
    %c114 = arith.constant 114 : index
    %777 = memref.load %arg1[%c114] : memref<227xf32, #tpu.memory_space<smem>>
    %778 = vector.broadcast %777 : f32 to vector<8x128xf32>
    %779 = arith.mulf %100, %778 : vector<8x128xf32>
    %c124 = arith.constant 124 : index
    %780 = memref.load %arg1[%c124] : memref<227xf32, #tpu.memory_space<smem>>
    %781 = vector.broadcast %780 : f32 to vector<8x128xf32>
    %782 = arith.mulf %136, %781 : vector<8x128xf32>
    %783 = arith.addf %779, %782 : vector<8x128xf32>
    %c134 = arith.constant 134 : index
    %784 = memref.load %arg1[%c134] : memref<227xf32, #tpu.memory_space<smem>>
    %785 = vector.broadcast %784 : f32 to vector<8x128xf32>
    %786 = arith.mulf %172, %785 : vector<8x128xf32>
    %787 = arith.addf %783, %786 : vector<8x128xf32>
    %c144 = arith.constant 144 : index
    %788 = memref.load %arg1[%c144] : memref<227xf32, #tpu.memory_space<smem>>
    %789 = vector.broadcast %788 : f32 to vector<8x128xf32>
    %790 = arith.mulf %208, %789 : vector<8x128xf32>
    %791 = arith.addf %787, %790 : vector<8x128xf32>
    %c154 = arith.constant 154 : index
    %792 = memref.load %arg1[%c154] : memref<227xf32, #tpu.memory_space<smem>>
    %793 = vector.broadcast %792 : f32 to vector<8x128xf32>
    %794 = arith.mulf %244, %793 : vector<8x128xf32>
    %795 = arith.addf %791, %794 : vector<8x128xf32>
    %c164 = arith.constant 164 : index
    %796 = memref.load %arg1[%c164] : memref<227xf32, #tpu.memory_space<smem>>
    %797 = vector.broadcast %796 : f32 to vector<8x128xf32>
    %798 = arith.mulf %280, %797 : vector<8x128xf32>
    %799 = arith.addf %795, %798 : vector<8x128xf32>
    %c174 = arith.constant 174 : index
    %800 = memref.load %arg1[%c174] : memref<227xf32, #tpu.memory_space<smem>>
    %801 = vector.broadcast %800 : f32 to vector<8x128xf32>
    %802 = arith.mulf %316, %801 : vector<8x128xf32>
    %803 = arith.addf %799, %802 : vector<8x128xf32>
    %c184 = arith.constant 184 : index
    %804 = memref.load %arg1[%c184] : memref<227xf32, #tpu.memory_space<smem>>
    %805 = vector.broadcast %804 : f32 to vector<8x128xf32>
    %806 = arith.mulf %352, %805 : vector<8x128xf32>
    %807 = arith.addf %803, %806 : vector<8x128xf32>
    %c194 = arith.constant 194 : index
    %808 = memref.load %arg1[%c194] : memref<227xf32, #tpu.memory_space<smem>>
    %809 = vector.broadcast %808 : f32 to vector<8x128xf32>
    %810 = arith.mulf %388, %809 : vector<8x128xf32>
    %811 = arith.addf %807, %810 : vector<8x128xf32>
    %c204 = arith.constant 204 : index
    %812 = memref.load %arg1[%c204] : memref<227xf32, #tpu.memory_space<smem>>
    %813 = vector.broadcast %812 : f32 to vector<8x128xf32>
    %814 = arith.mulf %424, %813 : vector<8x128xf32>
    %815 = arith.addf %811, %814 : vector<8x128xf32>
    %c214 = arith.constant 214 : index
    %816 = memref.load %arg1[%c214] : memref<227xf32, #tpu.memory_space<smem>>
    %817 = vector.broadcast %816 : f32 to vector<8x128xf32>
    %818 = arith.addf %815, %817 : vector<8x128xf32>
    %cst_27 = arith.constant 0.000000e+00 : f32
    %819 = vector.broadcast %cst_27 : f32 to vector<8x128xf32>
    %820 = arith.maximumf %818, %819 : vector<8x128xf32>
    %c115 = arith.constant 115 : index
    %821 = memref.load %arg1[%c115] : memref<227xf32, #tpu.memory_space<smem>>
    %822 = vector.broadcast %821 : f32 to vector<8x128xf32>
    %823 = arith.mulf %100, %822 : vector<8x128xf32>
    %c125 = arith.constant 125 : index
    %824 = memref.load %arg1[%c125] : memref<227xf32, #tpu.memory_space<smem>>
    %825 = vector.broadcast %824 : f32 to vector<8x128xf32>
    %826 = arith.mulf %136, %825 : vector<8x128xf32>
    %827 = arith.addf %823, %826 : vector<8x128xf32>
    %c135 = arith.constant 135 : index
    %828 = memref.load %arg1[%c135] : memref<227xf32, #tpu.memory_space<smem>>
    %829 = vector.broadcast %828 : f32 to vector<8x128xf32>
    %830 = arith.mulf %172, %829 : vector<8x128xf32>
    %831 = arith.addf %827, %830 : vector<8x128xf32>
    %c145 = arith.constant 145 : index
    %832 = memref.load %arg1[%c145] : memref<227xf32, #tpu.memory_space<smem>>
    %833 = vector.broadcast %832 : f32 to vector<8x128xf32>
    %834 = arith.mulf %208, %833 : vector<8x128xf32>
    %835 = arith.addf %831, %834 : vector<8x128xf32>
    %c155 = arith.constant 155 : index
    %836 = memref.load %arg1[%c155] : memref<227xf32, #tpu.memory_space<smem>>
    %837 = vector.broadcast %836 : f32 to vector<8x128xf32>
    %838 = arith.mulf %244, %837 : vector<8x128xf32>
    %839 = arith.addf %835, %838 : vector<8x128xf32>
    %c165 = arith.constant 165 : index
    %840 = memref.load %arg1[%c165] : memref<227xf32, #tpu.memory_space<smem>>
    %841 = vector.broadcast %840 : f32 to vector<8x128xf32>
    %842 = arith.mulf %280, %841 : vector<8x128xf32>
    %843 = arith.addf %839, %842 : vector<8x128xf32>
    %c175 = arith.constant 175 : index
    %844 = memref.load %arg1[%c175] : memref<227xf32, #tpu.memory_space<smem>>
    %845 = vector.broadcast %844 : f32 to vector<8x128xf32>
    %846 = arith.mulf %316, %845 : vector<8x128xf32>
    %847 = arith.addf %843, %846 : vector<8x128xf32>
    %c185 = arith.constant 185 : index
    %848 = memref.load %arg1[%c185] : memref<227xf32, #tpu.memory_space<smem>>
    %849 = vector.broadcast %848 : f32 to vector<8x128xf32>
    %850 = arith.mulf %352, %849 : vector<8x128xf32>
    %851 = arith.addf %847, %850 : vector<8x128xf32>
    %c195 = arith.constant 195 : index
    %852 = memref.load %arg1[%c195] : memref<227xf32, #tpu.memory_space<smem>>
    %853 = vector.broadcast %852 : f32 to vector<8x128xf32>
    %854 = arith.mulf %388, %853 : vector<8x128xf32>
    %855 = arith.addf %851, %854 : vector<8x128xf32>
    %c205 = arith.constant 205 : index
    %856 = memref.load %arg1[%c205] : memref<227xf32, #tpu.memory_space<smem>>
    %857 = vector.broadcast %856 : f32 to vector<8x128xf32>
    %858 = arith.mulf %424, %857 : vector<8x128xf32>
    %859 = arith.addf %855, %858 : vector<8x128xf32>
    %c215 = arith.constant 215 : index
    %860 = memref.load %arg1[%c215] : memref<227xf32, #tpu.memory_space<smem>>
    %861 = vector.broadcast %860 : f32 to vector<8x128xf32>
    %862 = arith.addf %859, %861 : vector<8x128xf32>
    %cst_28 = arith.constant 0.000000e+00 : f32
    %863 = vector.broadcast %cst_28 : f32 to vector<8x128xf32>
    %864 = arith.maximumf %862, %863 : vector<8x128xf32>
    %c216 = arith.constant 216 : index
    %865 = memref.load %arg1[%c216] : memref<227xf32, #tpu.memory_space<smem>>
    %866 = vector.broadcast %865 : f32 to vector<8x128xf32>
    %867 = arith.mulf %468, %866 : vector<8x128xf32>
    %c217 = arith.constant 217 : index
    %868 = memref.load %arg1[%c217] : memref<227xf32, #tpu.memory_space<smem>>
    %869 = vector.broadcast %868 : f32 to vector<8x128xf32>
    %870 = arith.mulf %512, %869 : vector<8x128xf32>
    %871 = arith.addf %867, %870 : vector<8x128xf32>
    %c218 = arith.constant 218 : index
    %872 = memref.load %arg1[%c218] : memref<227xf32, #tpu.memory_space<smem>>
    %873 = vector.broadcast %872 : f32 to vector<8x128xf32>
    %874 = arith.mulf %556, %873 : vector<8x128xf32>
    %875 = arith.addf %871, %874 : vector<8x128xf32>
    %c219 = arith.constant 219 : index
    %876 = memref.load %arg1[%c219] : memref<227xf32, #tpu.memory_space<smem>>
    %877 = vector.broadcast %876 : f32 to vector<8x128xf32>
    %878 = arith.mulf %600, %877 : vector<8x128xf32>
    %879 = arith.addf %875, %878 : vector<8x128xf32>
    %c220 = arith.constant 220 : index
    %880 = memref.load %arg1[%c220] : memref<227xf32, #tpu.memory_space<smem>>
    %881 = vector.broadcast %880 : f32 to vector<8x128xf32>
    %882 = arith.mulf %644, %881 : vector<8x128xf32>
    %883 = arith.addf %879, %882 : vector<8x128xf32>
    %c221 = arith.constant 221 : index
    %884 = memref.load %arg1[%c221] : memref<227xf32, #tpu.memory_space<smem>>
    %885 = vector.broadcast %884 : f32 to vector<8x128xf32>
    %886 = arith.mulf %688, %885 : vector<8x128xf32>
    %887 = arith.addf %883, %886 : vector<8x128xf32>
    %c222 = arith.constant 222 : index
    %888 = memref.load %arg1[%c222] : memref<227xf32, #tpu.memory_space<smem>>
    %889 = vector.broadcast %888 : f32 to vector<8x128xf32>
    %890 = arith.mulf %732, %889 : vector<8x128xf32>
    %891 = arith.addf %887, %890 : vector<8x128xf32>
    %c223 = arith.constant 223 : index
    %892 = memref.load %arg1[%c223] : memref<227xf32, #tpu.memory_space<smem>>
    %893 = vector.broadcast %892 : f32 to vector<8x128xf32>
    %894 = arith.mulf %776, %893 : vector<8x128xf32>
    %895 = arith.addf %891, %894 : vector<8x128xf32>
    %c224 = arith.constant 224 : index
    %896 = memref.load %arg1[%c224] : memref<227xf32, #tpu.memory_space<smem>>
    %897 = vector.broadcast %896 : f32 to vector<8x128xf32>
    %898 = arith.mulf %820, %897 : vector<8x128xf32>
    %899 = arith.addf %895, %898 : vector<8x128xf32>
    %c225 = arith.constant 225 : index
    %900 = memref.load %arg1[%c225] : memref<227xf32, #tpu.memory_space<smem>>
    %901 = vector.broadcast %900 : f32 to vector<8x128xf32>
    %902 = arith.mulf %864, %901 : vector<8x128xf32>
    %903 = arith.addf %899, %902 : vector<8x128xf32>
    %c226 = arith.constant 226 : index
    %904 = memref.load %arg1[%c226] : memref<227xf32, #tpu.memory_space<smem>>
    %905 = vector.broadcast %904 : f32 to vector<8x128xf32>
    %906 = arith.addf %903, %905 : vector<8x128xf32>
    %c0_29 = arith.constant 0 : index
    %c0_30 = arith.constant 0 : index
    %907 = vector.load %arg3[%c0_29, %c0_30] : memref<8x128xf32, #tpu.memory_space<vmem>>, vector<8x128xf32>
    tpu.vector_store %arg3[%c0_29, %c0_30], %906 {strides = array<i32>} : memref<8x128xf32, #tpu.memory_space<vmem>>, vector<8x128xf32>,
    return
  }
  func.func @transform_0(%arg0: i32, %arg1: memref<227xf32, #tpu.memory_space<smem>>) -> (i32, i32) {
    %c0_i32 = arith.constant 0 : i32
    %c0_i32_0 = arith.constant 0 : i32
    return %arg0, %c0_i32 : i32, i32
  }
  func.func @transform_1(%arg0: i32, %arg1: memref<227xf32, #tpu.memory_space<smem>>) -> (i32, i32) {
    %c0_i32 = arith.constant 0 : i32
    %c0_i32_0 = arith.constant 0 : i32
    return %arg0, %c0_i32 : i32, i32
  }
}

</mosaic_0001>

<bundles_post_ra>
// kernel: tpu_custom_call.1
= control target key start
LH: loop header
LB: loop body
LE: loop exit
PB: predicated region body
PF: predicated region fallthrough
CT: control target
= control target key end

     0   :  { %s1204_s9 = smov [#allocation3]   ;;  %s2158_s0 = inlined_call_operand.hbm [shape: f32[227], index: 0, kind: input, shape index: {}]   ;;  %s2159_s1 = inlined_call_operand.hbm [shape: f32[8,128], index: 1, kind: input, shape index: {}]   ;;  %s2160_s2 = inlined_call_operand.hbm [shape: f32[8,128], index: 2, kind: output, shape index: {}]  }
   0x1   :  { %2162 = sst [smem:[#allocation47_spill]] %s2160_s2 }
   0x2   :  { %8 = dma.hbm_to_smem %s2158_s0, 32, %s1204_s9, [#allocation2] }
   0x3   :  { %1198 = dma.done.wait [#allocation2], 32 }
   0x4   :  { %1199 = vsyncadd [#allocation2], 4294967264 }
   0x5   :  { %10 = sfence }
   0x6   :  { %11 = vsyncpa [#allocation5], 0 }
   0x7   :  { %12 = vsyncpa [#allocation6], 0  ;;  %s1205_s12 = smov [#allocation4]  }
   0x8   :  { %s19_s13 = sshll.u32 %s1205_s12, 4  ;;  %s20_s13 = int_to_ptr.vmem [resolvable:$true] %s19_s13 }
   0x9   :  { %s1166_s14 = scalar_lea.vmem %s20_s13, 128  ;;  %p1171_p1 = scmp.lt.s32.totalorder %s20_s13, %s20_s13 }
   0xa   :  { %p1167_p0 = scmp.ne.s32.totalorder %s20_s13, %s1166_s14  ;;  %p1172_p2 = scmp.lt.s32.totalorder %s1166_s14, %s1166_s14 }
   0xc   :  { %p1173_p3 = por %p1172_p2, %p1171_p1 }
   0xe   :  { %p1174_p4 = pnand %p1173_p3, %p1167_p0 }
  0x10   :  { %1177 = shalt.err (!%p1174_p4)
}
  0x11   :  { %22 = dma.hbm_to_vmem [thread:$0]  %s2159_s1, 128, %s20_s13, [#allocation5]  }
  0x12   :  { %1200 = dma.done.wait [#allocation5], 128  }
  0x13   :  { %1201 = vsyncadd [#allocation5], 4294967168  ;;  %s1228_s0 = sld [smem:[#allocation3]]  ;;  %v1344_v0 = vld [vmem:[#allocation4] sm:$0xff] }
  0x14   :  { %s1230_s17 = sld [smem:[#allocation3 + $0x8]] }
  0x15   :  { %s1232_s18 = sld [smem:[#allocation3 + $0x1]] }
  0x16   :  { %s1234_s19 = sld [smem:[#allocation3 + $0x9]] }
  0x17   :  { %s1236_s20 = sld [smem:[#allocation3 + $0x2]] }
  0x18   :  { %s1238_s21 = sld [smem:[#allocation3 + $0xa]] }
  0x19   :  { %s1240_s22 = sld [smem:[#allocation3 + $0x3]]  ;;  %v28_v1 = vstv %s1228_s0 }
  0x1a   :  { %s1242_s23 = sld [smem:[#allocation3 + $0xb]]  ;;  %v29_v3 = vmul.f32 %v28_v1, %v1344_v0  ;;  %v31_v5 = vstv %s1230_s17 }
  0x1b   :  { %s1244_s24 = sld [smem:[#allocation3 + $0x4]]  ;;  %v35_v2 = vstv %s1232_s18 }
  0x1c   :  { %s1246_s1 = sld [smem:[#allocation3 + $0xc]]  ;;  %v36_v4 = vmul.f32 %v35_v2, %v1344_v0  ;;  %v38_v6 = vstv %s1234_s19  ;;  %v32_v9 = vadd.f32 %v31_v5, %v29_v3 }
  0x1d   :  { %s1248_s25 = sld [smem:[#allocation3 + $0x5]]  ;;  %v42_v7 = vstv %s1236_s20 }
  0x1e   :  { %s1250_s26 = sld [smem:[#allocation3 + $0xd]]  ;;  %v39_v10 = vadd.f32 %v38_v6, %v36_v4  ;;  %v43_v11 = vmul.f32 %v42_v7, %v1344_v0  ;;  %v45_v12 = vstv %s1238_s21  ;;  %v1381_v16 = vmax.f32 %v32_v9, 0.0 }
  0x1f   :  { %s1252_s27 = sld [smem:[#allocation3 + $0x6]]  ;;  %v49_v8 = vstv %s1240_s22 }
  0x20   :  { %s1254_s28 = sld [smem:[#allocation3 + $0xe]]  ;;  %v50_v13 = vmul.f32 %v49_v8, %v1344_v0  ;;  %v52_v15 = vstv %s1242_s23  ;;  %v1383_v17 = vmax.f32 %v39_v10, 0.0  ;;  %v46_v18 = vadd.f32 %v45_v12, %v43_v11 }
  0x21   :  { %s1256_s29 = sld [smem:[#allocation3 + $0x7]]  ;;  %v56_v14 = vstv %s1244_s24 }
  0x22   :  { %s1258_s30 = sld [smem:[#allocation3 + $0xf]]  ;;  %v57_v19 = vmul.f32 %v56_v14, %v1344_v0  ;;  %v53_v20 = vadd.f32 %v52_v15, %v50_v13  ;;  %v59_v21 = vstv %s1246_s1  ;;  %v1400_v27 = vmax.f32 %v46_v18, 0.0 }
  0x23   :  { %s1260_s3 = sld [smem:[#allocation3 + $0x10]]  ;;  %v63_v24 = vstv %s1248_s25 }
  0x24   :  { %s1262_s4 = sld [smem:[#allocation3 + $0x1a]]  ;;  %v60_v28 = vadd.f32 %v59_v21, %v57_v19  ;;  %v1406_v31 = vmax.f32 %v53_v20, 0.0  ;;  %v64_v32 = vmul.f32 %v63_v24, %v1344_v0  ;;  %v66_v39 = vstv %s1250_s26 }
  0x25   :  { %s1264_s5 = sld [smem:[#allocation3 + $0x24]]  ;;  %v70_v40 = vstv %s1252_s27 }
  0x26   :  { %2163 = sst [smem:[#allocation11_spill]] %s1254_s28  ;;  %v1425_v43 = vmax.f32 %v60_v28, 0.0  ;;  %v67_v55 = vadd.f32 %v66_v39, %v64_v32  ;;  %v71_v56 = vmul.f32 %v70_v40, %v1344_v0 }
  0x27   :  { %2164 = sst [smem:[#allocation12_spill]] %s1256_s29 }
  0x28   :  { %2165 = sst [smem:[#allocation13_spill]] %s1258_s30  ;;  %v1461_v8 = vmax.f32 %v67_v55, 0.0 }
  0x29   :  { %s1266_s6 = sld [smem:[#allocation3 + $0x2e]]  ;;  %v84_v22 = vstv %s1260_s3 }
  0x2a   :  { %s1268_s7 = sld [smem:[#allocation3 + $0x38]]  ;;  %v87_v23 = vstv %s1262_s4  ;;  %v85_v29 = vmul.f32 %v84_v22, %v1381_v16 }
  0x2b   :  { %s1270_s8 = sld [smem:[#allocation3 + $0x42]]  ;;  %v88_v30 = vmul.f32 %v87_v23, %v1383_v17  ;;  %v91_v33 = vstv %s1264_s5 }
  0x2c   :  { %s1272_s9 = sld [smem:[#allocation3 + $0x4c]]  ;;  %v92_v45 = vmul.f32 %v91_v33, %v1400_v27 }
  0x2d   :  { %s1274_s10 = sld [smem:[#allocation3 + $0x56]]  ;;  %v89_v44 = vadd.f32 %v88_v30, %v85_v29 }
  0x2e   :  { %s1276_s11 = sld [smem:[#allocation3 + $0x60]] }
  0x2f   :  { %2166 = sst [smem:[#allocation14_spill]] %s1266_s6  ;;  %v93_v60 = vadd.f32 %v92_v45, %v89_v44 }
  0x30   :  { %2167 = sst [smem:[#allocation15_spill]] %s1268_s7 }
  0x31   :  { %2168 = sst [smem:[#allocation16_spill]] %s1270_s8 }
  0x32   :  { %2169 = sst [smem:[#allocation17_spill]] %s1272_s9 }
  0x33   :  { %2170 = sst [smem:[#allocation18_spill]] %s1274_s10 }
  0x34   :  { %2171 = sst [smem:[#allocation19_spill]] %s1276_s11 }
  0x35   :  { %s1278_s12 = sld [smem:[#allocation3 + $0x11]] }
  0x36   :  { %s1280_s13 = sld [smem:[#allocation3 + $0x1b]] }
  0x37   :  { %s1282_s14 = sld [smem:[#allocation3 + $0x25]] }
  0x38   :  { %s1284_s15 = sld [smem:[#allocation3 + $0x2f]] }
  0x39   :  { %s1286_s16 = sld [smem:[#allocation3 + $0x39]] }
  0x3a   :  { %s1288_s2 = sld [smem:[#allocation3 + $0x43]] }
  0x3b   :  { %s1290_s30 = sld [smem:[#allocation3 + $0x4d]]  ;;  %v119_v25 = vstv %s1278_s12 }
  0x3c   :  { %s1292_s8 = sld [smem:[#allocation3 + $0x57]]  ;;  %v122_v26 = vstv %s1280_s13  ;;  %v120_v34 = vmul.f32 %v119_v25, %v1381_v16 }
  0x3d   :  { %s1294_s9 = sld [smem:[#allocation3 + $0x61]]  ;;  %v123_v35 = vmul.f32 %v122_v26, %v1383_v17  ;;  %v126_v36 = vstv %s1282_s14 }
  0x3e   :  { %2172 = sst [smem:[#allocation20_spill]] %s1284_s15  ;;  %v127_v47 = vmul.f32 %v126_v36, %v1400_v27 }
  0x3f   :  { %2173 = sst [smem:[#allocation21_spill]] %s1286_s16  ;;  %v124_v51 = vadd.f32 %v123_v35, %v120_v34 }
  0x40   :  { %2174 = sst [smem:[#allocation22_spill]] %s1288_s2 }
  0x41   :  { %2175 = sst [smem:[#allocation23_spill]] %s1290_s30  ;;  %v128_v4 = vadd.f32 %v127_v47, %v124_v51 }
  0x42   :  { %2176 = sst [smem:[#allocation24_spill]] %s1292_s8 }
  0x43   :  { %2177 = sst [smem:[#allocation25_spill]] %s1294_s9 }
  0x44   :  { %s1296_s10 = sld [smem:[#allocation3 + $0x12]] }
  0x45   :  { %s1298_s11 = sld [smem:[#allocation3 + $0x1c]] }
  0x46   :  { %s1300_s7 = sld [smem:[#allocation3 + $0x26]] }
  0x47   :  { %s1302_s29 = sld [smem:[#allocation3 + $0x30]] }
  0x48   :  { %s1304_s28 = sld [smem:[#allocation3 + $0x3a]] }
  0x49   :  { %s1306_s15 = sld [smem:[#allocation3 + $0x44]] }
  0x4a   :  { %s1308_s16 = sld [smem:[#allocation3 + $0x4e]]  ;;  %v154_v37 = vstv %s1296_s10 }
  0x4b   :  { %s1310_s2 = sld [smem:[#allocation3 + $0x58]]  ;;  %v157_v38 = vstv %s1298_s11  ;;  %v155_v49 = vmul.f32 %v154_v37, %v1381_v16 }
  0x4c   :  { %2178 = sst [smem:[#allocation26_spill]] %s1300_s7  ;;  %v158_v50 = vmul.f32 %v157_v38, %v1383_v17 }
  0x4d   :  { %2179 = sst [smem:[#allocation27_spill]] %s1302_s29 }
  0x4e   :  { %2180 = sst [smem:[#allocation28_spill]] %s1304_s28  ;;  %v159_v2 = vadd.f32 %v158_v50, %v155_v49 }
  0x4f   :  { %2181 = sst [smem:[#allocation29_spill]] %s1306_s15 }
  0x50   :  { %2182 = sst [smem:[#allocation30_spill]] %s1308_s16 }
  0x51   :  { %2183 = sst [smem:[#allocation31_spill]] %s1310_s2 }
  0x52   :  { %s1312_s30 = sld [smem:[#allocation3 + $0x62]] }
  0x53   :  { %s1314_s8 = sld [smem:[#allocation3 + $0x13]] }
  0x54   :  { %s1316_s9 = sld [smem:[#allocation3 + $0x1d]] }
  0x55   :  { %s1318_s6 = sld [smem:[#allocation3 + $0x27]] }
  0x56   :  { %s1320_s7 = sld [smem:[#allocation3 + $0x31]] }
  0x57   :  { %s1322_s29 = sld [smem:[#allocation3 + $0x3b]] }
  0x58   :  { %2184 = sst [smem:[#allocation32_spill]] %s1312_s30 }
  0x59   :  { %s1324_s28 = sld [smem:[#allocation3 + $0x45]]  ;;  %v189_v41 = vstv %s1314_s8 }
  0x5a   :  { %2185 = sst [smem:[#allocation33_spill]] %s1316_s9  ;;  %v190_v53 = vmul.f32 %v189_v41, %v1381_v16 }
  0x5b   :  { %2186 = sst [smem:[#allocation34_spill]] %s1318_s6 }
  0x5c   :  { %2187 = sst [smem:[#allocation35_spill]] %s1320_s7 }
  0x5d   :  { %2188 = sst [smem:[#allocation36_spill]] %s1322_s29 }
  0x5e   :  { %s1326_s15 = sld [smem:[#allocation3 + $0x4f]] }
  0x5f   :  { %2189 = sst [smem:[#allocation37_spill]] %s1324_s28 }
  0x60   :  { %s1328_s16 = sld [smem:[#allocation3 + $0x59]] }
  0x61   :  { %s1330_s2 = sld [smem:[#allocation3 + $0x63]] }
  0x62   :  { %s1332_s30 = sld [smem:[#allocation3 + $0x14]] }
  0x63   :  { %s1334_s9 = sld [smem:[#allocation3 + $0x1e]] }
  0x64   :  { %2190 = sst [smem:[#allocation38_spill]] %s1326_s15 }
  0x65   :  { %s1336_s6 = sld [smem:[#allocation3 + $0x28]] }
  0x66   :  { %2191 = sst [smem:[#allocation39_spill]] %s1328_s16 }
  0x67   :  { %2192 = sst [smem:[#allocation40_spill]] %s1330_s2 }
  0x68   :  { %s1338_s7 = sld [smem:[#allocation3 + $0x32]]  ;;  %v224_v37 = vstv %s1332_s30 }
  0x69   :  { %s1340_s29 = sld [smem:[#allocation3 + $0x3c]]  ;;  %v227_v38 = vstv %s1334_s9  ;;  %v225_v50 = vmul.f32 %v224_v37, %v1381_v16 }
  0x6a   :  { %s1342_s28 = sld [smem:[#allocation3 + $0x46]]  ;;  %v228_v51 = vmul.f32 %v227_v38, %v1383_v17 }
  0x6b   :  { %s1348_s2 = sld [smem:[#allocation3 + $0x50]]  ;;  %v231_v55 = vstv %s1336_s6 }
  0x6c   :  { %s1350_s16 = sld [smem:[#allocation3 + $0x5a]] }
  0x6d   :  { %s1352_s15 = sld [smem:[#allocation3 + $0x64]] }
  0x6e   :  { %2193 = sst [smem:[#allocation41_spill]] %s1338_s7 }
  0x6f   :  { %s1356_s7 = sld [smem:[#allocation3 + $0x15]] }
  0x70   :  { %s1361_s0 = sld [smem:[#allocation3 + $0x1f]] }
  0x71   :  { %s1364_s18 = sld [smem:[#allocation3 + $0x29]] }
  0x72   :  { %2194 = sst [smem:[#allocation42_spill]] %s1350_s16 }
  0x73   :  { %2195 = sst [smem:[#allocation43_spill]] %s1352_s15 }
  0x74   :  { %s1366_s16 = sld [smem:[#allocation3 + $0x33]] }
  0x75   :  { %s1369_s15 = sld [smem:[#allocation3 + $0x3d]] }
  0x76   :  { %s1374_s17 = sld [smem:[#allocation3 + $0x47]] }
  0x77   :  { %s1377_s19 = sld [smem:[#allocation3 + $0x51]] }
  0x78   :  { %s1379_s20 = sld [smem:[#allocation3 + $0x5b]] }
  0x79   :  { %s1386_s21 = sld [smem:[#allocation3 + $0x65]] }
  0x7a   :  { %s1391_s22 = sld [smem:[#allocation3 + $0x16]] }
  0x7b   :  { %s1395_s23 = sld [smem:[#allocation3 + $0x20]] }
  0x7c   :  { %s1398_s24 = sld [smem:[#allocation3 + $0x2a]] }
  0x7d   :  { %2196 = sst [smem:[#allocation44_spill]] %s1377_s19 }
  0x7e   :  { %2197 = sst [smem:[#allocation45_spill]] %s1379_s20 }
  0x7f   :  { %2198 = sst [smem:[#allocation46_spill]] %s1386_s21 }
  0x80   :  { %s2199_s1 = sld [smem:[#allocation33_spill]]  ;;  %v294_v37 = vstv %s1391_s22 }
  0x81   :  { %s1404_s25 = sld [smem:[#allocation3 + $0x34]]  ;;  %v297_v38 = vstv %s1395_s23 }
  0x82   :  { %s2200_s3 = sld [smem:[#allocation14_spill]] }
  0x83   :  { %s1411_s4 = sld [smem:[#allocation3 + $0x3e]] }
  0x84   :  { %s2201_s12 = sld [smem:[#allocation20_spill]] }
  0x85   :  { %s1417_s13 = sld [smem:[#allocation3 + $0x48]] }
  0x86   :  { %s2203_s21 = sld [smem:[#allocation26_spill]]  ;;  %v192_v42 = vstv %s2199_s1 }
  0x87   :  { %s1423_s20 = sld [smem:[#allocation3 + $0x52]]  ;;  %v193_v54 = vmul.f32 %v192_v42, %v1383_v17 }
  0x88   :  { %s2205_s5 = sld [smem:[#allocation11_spill]]  ;;  %v95_v46 = vstv %s2200_s3 }
  0x89   :  { %s2206_s19 = sld [smem:[#allocation34_spill]]  ;;  %v96_v61 = vmul.f32 %v95_v46, %v1406_v31  ;;  %v194_v6 = vadd.f32 %v193_v54, %v190_v53 }
  0x8a   :  { %s1429_s14 = sld [smem:[#allocation3 + $0x5c]]  ;;  %v130_v48 = vstv %s2201_s12 }
  0x8b   :  { %2202 = sst [smem:[#allocation33_spill]] %s1417_s13  ;;  %v131_v63 = vmul.f32 %v130_v48, %v1406_v31  ;;  %v97_v13 = vadd.f32 %v96_v61, %v93_v60 }
  0x8c   :  { %s2208_s10 = sld [smem:[#allocation12_spill]]  ;;  %v161_v52 = vstv %s2203_s21 }
  0x8d   :  { %2204 = sst [smem:[#allocation14_spill]] %s1423_s20  ;;  %v162_v3 = vmul.f32 %v161_v52, %v1400_v27 }
  0x8e   :  { %s2209_s26 = sld [smem:[#allocation15_spill]]  ;;  %v73_v57 = vstv %s2205_s5 }
  0x8f   :  { %s1435_s27 = sld [smem:[#allocation3 + $0x66]]  ;;  %v196_v58 = vstv %s2206_s19  ;;  %v74_v9 = vadd.f32 %v73_v57, %v71_v56  ;;  %v163_v20 = vadd.f32 %v162_v3, %v159_v2 }
  0x90   :  { %2207 = sst [smem:[#allocation20_spill]] %s1429_s14  ;;  %v197_v7 = vmul.f32 %v196_v58, %v1400_v27 }
  0x91   :  { %s2211_s8 = sld [smem:[#allocation21_spill]]  ;;  %v1481_v25 = vmax.f32 %v74_v9, 0.0 }
  0x92   :  { %s1440_s11 = sld [smem:[#allocation3 + $0x17]]  ;;  %v77_v59 = vstv %s2208_s10  ;;  %v198_v23 = vadd.f32 %v197_v7, %v194_v6 }
  0x93   :  { %s2212_s1 = sld [smem:[#allocation27_spill]]  ;;  %v78_v10 = vmul.f32 %v77_v59, %v1344_v0  ;;  %v132_v0 = vadd.f32 %v131_v63, %v128_v4  ;;  %v229_v63 = vadd.f32 %v228_v51, %v225_v50  ;;  %v270_v50 = vstv %s1366_s16 }
  0x94   :  { %s1445_s3 = sld [smem:[#allocation3 + $0x21]]  ;;  %v99_v62 = vstv %s2209_s26  ;;  %v295_v51 = vmul.f32 %v294_v37, %v1381_v16 }
  0x95   :  { %2210 = sst [smem:[#allocation26_spill]] %s1435_s27  ;;  %v100_v14 = vmul.f32 %v99_v62, %v1425_v43 }
  0x96   :  { %s2213_s12 = sld [smem:[#allocation35_spill]] }
  0x97   :  { %s1450_s21 = sld [smem:[#allocation3 + $0x2b]]  ;;  %v134_v1 = vstv %s2211_s8  ;;  %v101_v30 = vadd.f32 %v100_v14, %v97_v13  ;;  %v259_v14 = vstv %s1356_s7 }
  0x98   :  { %s2214_s27 = sld [smem:[#allocation13_spill]]  ;;  %v135_v18 = vmul.f32 %v134_v1, %v1425_v43  ;;  %v232_v1 = vmul.f32 %v231_v55, %v1400_v27  ;;  %v301_v55 = vstv %s1398_s24 }
  0x99   :  { %s2215_s14 = sld [smem:[#allocation16_spill]]  ;;  %v165_v5 = vstv %s2212_s1 }
  0x9a   :  { %s1455_s5 = sld [smem:[#allocation3 + $0x35]]  ;;  %v166_v21 = vmul.f32 %v165_v5, %v1406_v31  ;;  %v136_v39 = vadd.f32 %v135_v18, %v132_v0 }
  0x9b   :  { %s2217_s19 = sld [smem:[#allocation22_spill]] }
  0x9c   :  { %s1459_s10 = sld [smem:[#allocation3 + $0x3f]]  ;;  %v200_v11 = vstv %s2213_s12  ;;  %v167_v35 = vadd.f32 %v166_v21, %v163_v20  ;;  %v239_v21 = vstv %s1340_s29 }
  0x9d   :  { %s2219_s26 = sld [smem:[#allocation28_spill]]  ;;  %v201_v24 = vmul.f32 %v200_v11, %v1406_v31 }
  0x9e   :  { %s1465_s8 = sld [smem:[#allocation3 + $0x49]]  ;;  %v80_v12 = vstv %s2214_s27 }
  0x9f   :  { %s2221_s20 = sld [smem:[#allocation36_spill]]  ;;  %v103_v15 = vstv %s2215_s14  ;;  %v81_v26 = vadd.f32 %v80_v12, %v78_v10  ;;  %v202_v41 = vadd.f32 %v201_v24, %v198_v23  ;;  %v233_v12 = vadd.f32 %v232_v1, %v229_v63 }
  0xa0   :  { %2216 = sst [smem:[#allocation11_spill]] %s1455_s5  ;;  %v104_v28 = vmul.f32 %v103_v15, %v1461_v8  ;;  %v262_v15 = vstv %s1361_s0  ;;  %v271_v63 = vmul.f32 %v270_v50, %v1406_v31 }
  0xa1   :  { %s1470_s1 = sld [smem:[#allocation3 + $0x53]]  ;;  %v138_v19 = vstv %s2217_s19  ;;  %v1501_v44 = vmax.f32 %v81_v26, 0.0 }
  0xa2   :  { %2218 = sst [smem:[#allocation34_spill]] %s1459_s10  ;;  %v139_v33 = vmul.f32 %v138_v19, %v1461_v8  ;;  %v105_v48 = vadd.f32 %v104_v28, %v101_v30  ;;  %v260_v28 = vmul.f32 %v259_v14, %v1381_v16 }
  0xa3   :  { %s2223_s10 = sld [smem:[#allocation17_spill]]  ;;  %v169_v22 = vstv %s2219_s26 }
  0xa4   :  { %2220 = sst [smem:[#allocation12_spill]] %s1465_s8  ;;  %v170_v36 = vmul.f32 %v169_v22, %v1425_v43  ;;  %v140_v56 = vadd.f32 %v139_v33, %v136_v39  ;;  %v243_v33 = vstv %s1342_s28 }
  0xa5   :  { %s2224_s13 = sld [smem:[#allocation23_spill]]  ;;  %v204_v29 = vstv %s2221_s20 }
  0xa6   :  { %s1475_s5 = sld [smem:[#allocation3 + $0x5d]]  ;;  %v205_v42 = vmul.f32 %v204_v29, %v1425_v43  ;;  %v171_v53 = vadd.f32 %v170_v36, %v167_v35  ;;  %v263_v29 = vmul.f32 %v262_v15, %v1383_v17 }
  0xa7   :  { %2222 = sst [smem:[#allocation15_spill]] %s1470_s1 }
  0xa8   :  { %s1479_s14 = sld [smem:[#allocation3 + $0x67]]  ;;  %v206_v58 = vadd.f32 %v205_v42, %v202_v41 }
  0xa9   :  { %s2227_s27 = sld [smem:[#allocation29_spill]]  ;;  %v107_v32 = vstv %s2223_s10 }
  0xaa   :  { %s1485_s12 = sld [smem:[#allocation3 + $0x18]]  ;;  %v108_v45 = vmul.f32 %v107_v32, %v1481_v25  ;;  %v240_v32 = vmul.f32 %v239_v21, %v1425_v43  ;;  %v278_v21 = vstv %s1374_s17 }
  0xab   :  { %s2228_s19 = sld [smem:[#allocation18_spill]]  ;;  %v142_v34 = vstv %s2224_s13 }
  0xac   :  { %2225 = sst [smem:[#allocation21_spill]] %s1475_s5  ;;  %v143_v49 = vmul.f32 %v142_v34, %v1481_v25  ;;  %v109_v61 = vadd.f32 %v108_v45, %v105_v48  ;;  %v266_v34 = vstv %s1364_s18  ;;  %v244_v45 = vmul.f32 %v243_v33, %v1461_v8 }
  0xad   :  { %s2229_s26 = sld [smem:[#allocation37_spill]]  ;;  %v267_v48 = vmul.f32 %v266_v34, %v1400_v27 }
  0xae   :  { %2226 = sst [smem:[#allocation27_spill]] %s1479_s14  ;;  %v144_v6 = vadd.f32 %v143_v49, %v140_v56 }
  0xaf   :  { %s1490_s5 = sld [smem:[#allocation3 + $0x22]]  ;;  %v173_v40 = vstv %s2227_s27 }
  0xb0   :  { %s1495_s14 = sld [smem:[#allocation3 + $0x2c]]  ;;  %v174_v54 = vmul.f32 %v173_v40, %v1461_v8 }
  0xb1   :  { %s2230_s1 = sld [smem:[#allocation24_spill]]  ;;  %v111_v46 = vstv %s2228_s19 }
  0xb2   :  { %s1499_s20 = sld [smem:[#allocation3 + $0x36]]  ;;  %v112_v62 = vmul.f32 %v111_v46, %v1501_v44  ;;  %v175_v3 = vadd.f32 %v174_v54, %v171_v53  ;;  %v247_v46 = vstv %s1348_s2 }
  0xb3   :  { %s2231_s13 = sld [smem:[#allocation30_spill]]  ;;  %v208_v47 = vstv %s2229_s26 }
  0xb4   :  { %s1506_s30 = sld [smem:[#allocation3 + $0x40]]  ;;  %v209_v59 = vmul.f32 %v208_v47, %v1461_v8  ;;  %v113_v18 = vadd.f32 %v112_v62, %v109_v61  ;;  %v264_v47 = vadd.f32 %v263_v29, %v260_v28 }
  0xb5   :  { %s2233_s9 = sld [smem:[#allocation38_spill]] }
  0xb6   :  { %s1511_s10 = sld [smem:[#allocation3 + $0x4a]]  ;;  %v210_v9 = vadd.f32 %v209_v59, %v206_v58  ;;  %v329_v58 = vstv %s1440_s11  ;;  %v332_v59 = vstv %s1445_s3  ;;  %v268_v62 = vadd.f32 %v267_v48, %v264_v47 }
  0xb7   :  { %v146_v52 = vstv %s2230_s1  ;;  %s1516_s27 = sld [smem:[#allocation3 + $0x54]]  ;;  %v371_v37 = vstv %s1495_s14 }
  0xb8   :  { %s2236_s19 = sld [smem:[#allocation41_spill]]  ;;  %v147_v2 = vmul.f32 %v146_v52, %v1501_v44  ;;  %v298_v52 = vmul.f32 %v297_v38, %v1383_v17  ;;  %v272_v14 = vadd.f32 %v271_v63, %v268_v62  ;;  %v372_v50 = vmul.f32 %v371_v37, %v1400_v27 }
  0xb9   :  { %v177_v57 = vstv %s2231_s13  ;;  %s2237_s26 = sld [smem:[#allocation31_spill]] }
  0xba   :  { %2232 = sst [smem:[#allocation35_spill]] %s1506_s30  ;;  %v178_v4 = vmul.f32 %v177_v57, %v1481_v25  ;;  %v148_v22 = vadd.f32 %v147_v2, %v144_v6  ;;  %v274_v2 = vstv %s1369_s15  ;;  %v305_v6 = vstv %s1404_s25 }
  0xbb   :  { %s1520_s30 = sld [smem:[#allocation3 + $0x5e]]  ;;  %v212_v60 = vstv %s2233_s9  ;;  %v275_v15 = vmul.f32 %v274_v2, %v1425_v43 }
  0xbc   :  { %2234 = sst [smem:[#allocation13_spill]] %s1511_s10  ;;  %v213_v10 = vmul.f32 %v212_v60, %v1481_v25  ;;  %v179_v19 = vadd.f32 %v178_v4, %v175_v3  ;;  %v248_v60 = vmul.f32 %v247_v46, %v1481_v25  ;;  %v299_v3 = vadd.f32 %v298_v52, %v295_v51 }
  0xbd   :  { %2235 = sst [smem:[#allocation16_spill]] %s1516_s27  ;;  %v302_v4 = vmul.f32 %v301_v55, %v1400_v27  ;;  %v276_v34 = vadd.f32 %v275_v15, %v272_v14 }
  0xbe   :  { %s1523_s8 = sld [smem:[#allocation3 + $0x68]]  ;;  %v235_v5 = vstv %s2236_s19  ;;  %v214_v23 = vadd.f32 %v213_v10, %v210_v9  ;;  %v333_v9 = vmul.f32 %v332_v59, %v1383_v17 }
  0xbf   :  { %s2240_s10 = sld [smem:[#allocation39_spill]]  ;;  %v181_v7 = vstv %s2237_s26  ;;  %v236_v13 = vmul.f32 %v235_v5, %v1406_v31 }
  0xc0   :  { %s1527_s6 = sld [smem:[#allocation3 + $0x19]]  ;;  %v182_v20 = vmul.f32 %v181_v7, %v1501_v44  ;;  %v330_v7 = vmul.f32 %v329_v58, %v1381_v16 }
  0xc1   :  { %2238 = sst [smem:[#allocation22_spill]] %s1520_s30  ;;  %v237_v30 = vadd.f32 %v236_v13, %v233_v12  ;;  %v336_v13 = vstv %s1450_s21 }
  0xc2   :  { %s1532_s1 = sld [smem:[#allocation3 + $0x23]]  ;;  %v183_v36 = vadd.f32 %v182_v20, %v179_v19  ;;  %v367_v19 = vstv %s1490_s5 }
  0xc3   :  { %s2241_s13 = sld [smem:[#allocation19_spill]]  ;;  %v241_v49 = vadd.f32 %v240_v32, %v237_v30  ;;  %v368_v30 = vmul.f32 %v367_v19, %v1383_v17 }
  0xc4   :  { %2239 = sst [smem:[#allocation28_spill]] %s1523_s8 }
  0xc5   :  { %s1536_s9 = sld [smem:[#allocation3 + $0x2d]]  ;;  %v216_v11 = vstv %s2240_s10  ;;  %v245_v1 = vadd.f32 %v244_v45, %v241_v49 }
  0xc6   :  { %s1539_s8 = sld [smem:[#allocation3 + $0x37]]  ;;  %v217_v24 = vmul.f32 %v216_v11, %v1501_v44  ;;  %v399_v32 = vstv %s1527_s6 }
  0xc7   :  { %s2242_s30 = sld [smem:[#allocation25_spill]]  ;;  %v249_v20 = vadd.f32 %v248_v60, %v245_v1  ;;  %v400_v46 = vmul.f32 %v399_v32, %v1381_v16 }
  0xc8   :  { %s1544_s19 = sld [smem:[#allocation3 + $0x41]]  ;;  %v218_v41 = vadd.f32 %v217_v24, %v214_v23  ;;  %v309_v23 = vstv %s1411_s4  ;;  %v334_v24 = vadd.f32 %v333_v9, %v330_v7  ;;  %v402_v33 = vstv %s1532_s1 }
  0xc9   :  { %s1548_s26 = sld [smem:[#allocation3 + $0x4b]]  ;;  %v115_v0 = vstv %s2241_s13  ;;  %v403_v47 = vmul.f32 %v402_v33, %v1383_v17 }
  0xca   :  { %s1552_s7 = sld [smem:[#allocation3 + $0x55]]  ;;  %v116_v35 = vadd.f32 %v115_v0, %v113_v18  ;;  %v364_v18 = vstv %s1485_s12  ;;  %v303_v0 = vadd.f32 %v302_v4, %v299_v3 }
  0xcb   :  { %s2243_s0 = sld [smem:[#allocation32_spill]]  ;;  %v365_v29 = vmul.f32 %v364_v18, %v1381_v16  ;;  %v406_v51 = vstv %s1536_s9  ;;  %v404_v62 = vadd.f32 %v403_v47, %v400_v46 }
  0xcc   :  { %s2244_s10 = sld [smem:[#allocation40_spill]]  ;;  %v1582_v53 = vmax.f32 %v116_v35, 0.0  ;;  %v279_v35 = vmul.f32 %v278_v21, %v1461_v8  ;;  %v407_v63 = vmul.f32 %v406_v51, %v1400_v27  ;;  %v410_v4 = vstv %s1539_s8 }
  0xcd   :  { %v150_v26 = vstv %s2242_s30  ;;  %s1557_s27 = sld [smem:[#allocation3 + $0x5f]]  ;;  %v369_v49 = vadd.f32 %v368_v30, %v365_v29  ;;  %v411_v21 = vmul.f32 %v410_v4, %v1406_v31 }
  0xce   :  { %s1562_s29 = sld [smem:[#allocation3 + $0x69]]  ;;  %v151_v39 = vadd.f32 %v150_v26, %v148_v22  ;;  %v306_v22 = vmul.f32 %v305_v6, %v1406_v31  ;;  %v337_v26 = vmul.f32 %v336_v13, %v1400_v27 }
  0xcf   :  { %s1566_s30 = sld [smem:[#allocation3 + $0x6a]]  ;;  %v373_v2 = vadd.f32 %v372_v50, %v369_v49 }
  0xd0   :  { %s1570_s13 = sld [smem:[#allocation3 + $0x74]]  ;;  %v1587_v56 = vmax.f32 %v151_v39, 0.0  ;;  %v307_v39 = vadd.f32 %v306_v22, %v303_v0  ;;  %v338_v48 = vadd.f32 %v337_v26, %v334_v24  ;;  %v414_v24 = vstv %s1544_s19 }
  0xd1   :  { %v185_v40 = vstv %s2243_s0  ;;  %s1575_s28 = sld [smem:[#allocation3 + $0x7e]]  ;;  %v415_v37 = vmul.f32 %v414_v24, %v1425_v43 }
  0xd2   :  { %v220_v42 = vstv %s2244_s10  ;;  %s2245_s18 = sld [smem:[#allocation42_spill]]  ;;  %v186_v54 = vadd.f32 %v185_v40, %v183_v36  ;;  %v310_v40 = vmul.f32 %v309_v23, %v1425_v43 }
  0xd3   :  { %s1580_s22 = sld [smem:[#allocation3 + $0x88]]  ;;  %v221_v57 = vadd.f32 %v220_v42, %v218_v41 }
  0xd4   :  { %s1585_s2 = sld [smem:[#allocation3 + $0x92]]  ;;  %v1602_v5 = vmax.f32 %v186_v54, 0.0  ;;  %v280_v54 = vadd.f32 %v279_v35, %v276_v34  ;;  %v311_v17 = vadd.f32 %v310_v40, %v307_v39 }
  0xd5   :  { %s1591_s16 = sld [smem:[#allocation3 + $0x9c]]  ;;  %v1609_v10 = vmax.f32 %v221_v57, 0.0  ;;  %v375_v57 = vstv %s1499_s20  ;;  %v434_v14 = vstv %s1566_s30 }
  0xd6   :  { %s2246_s23 = sld [smem:[#allocation43_spill]]  ;;  %v376_v3 = vmul.f32 %v375_v57, %v1406_v31  ;;  %v437_v15 = vstv %s1570_s13  ;;  %v435_v29 = vmul.f32 %v434_v14, %v1582_v53 }
  0xd7   :  { %s1596_s0 = sld [smem:[#allocation3 + $0xa6]]  ;;  %v438_v30 = vmul.f32 %v437_v15, %v1587_v56  ;;  %v441_v34 = vstv %s1575_s28 }
  0xd8   :  { %v251_v61 = vstv %s2245_s18  ;;  %s1600_s24 = sld [smem:[#allocation3 + $0xb0]]  ;;  %v377_v22 = vadd.f32 %v376_v3, %v373_v2  ;;  %v442_v47 = vmul.f32 %v441_v34, %v1602_v5 }
  0xd9   :  { %s1607_s11 = sld [smem:[#allocation3 + $0xba]]  ;;  %v252_v11 = vmul.f32 %v251_v61, %v1501_v44  ;;  %v439_v46 = vadd.f32 %v438_v30, %v435_v29  ;;  %v445_v50 = vstv %s1580_s22 }
  0xda   :  { %s2247_s15 = sld [smem:[#allocation11_spill]]  ;;  %v449_v2 = vstv %s1585_s2 }
  0xdb   :  { %s1614_s3 = sld [smem:[#allocation3 + $0xc4]]  ;;  %v253_v52 = vadd.f32 %v252_v11, %v249_v20  ;;  %v408_v20 = vadd.f32 %v407_v63, %v404_v62 }
  0xdc   :  { %v255_v12 = vstv %s2246_s23  ;;  %s1619_s25 = sld [smem:[#allocation3 + $0xce]] }
  0xdd   :  { %s2250_s10 = sld [smem:[#allocation44_spill]]  ;;  %v256_v26 = vadd.f32 %v255_v12, %v253_v52  ;;  %v412_v12 = vadd.f32 %v411_v21, %v408_v20  ;;  %v453_v20 = vstv %s1591_s16 }
  0xde   :  { %s1623_s18 = sld [smem:[#allocation3 + $0x6b]] }
  0xdf   :  { %s2251_s21 = sld [smem:[#allocation45_spill]] }
  0xe0   :  { %v340_v28 = vstv %s2247_s15  ;;  %s1628_s12 = sld [smem:[#allocation3 + $0x75]] }
  0xe1   :  { %2248 = sst [smem:[#allocation36_spill]] %s1614_s3  ;;  %v341_v42 = vmul.f32 %v340_v28, %v1406_v31 }
  0xe2   :  { %2249 = sst [smem:[#allocation17_spill]] %s1619_s25 }
  0xe3   :  { %s2252_s3 = sld [smem:[#allocation33_spill]]  ;;  %v282_v36 = vstv %s2250_s10  ;;  %v342_v1 = vadd.f32 %v341_v42, %v338_v48  ;;  %v1713_v42 = vmax.f32 %v256_v26, 0.0 }
  0xe4   :  { %s2253_s17 = sld [smem:[#allocation34_spill]]  ;;  %v283_v55 = vmul.f32 %v282_v36, %v1481_v25 }
  0xe5   :  { %s1634_s5 = sld [smem:[#allocation3 + $0x7f]]  ;;  %v286_v38 = vstv %s2251_s21 }
  0xe6   :  { %s1639_s4 = sld [smem:[#allocation3 + $0x89]]  ;;  %v287_v16 = vmul.f32 %v286_v38, %v1501_v44  ;;  %v284_v6 = vadd.f32 %v283_v55, %v280_v54  ;;  %v416_v54 = vadd.f32 %v415_v37, %v412_v12  ;;  %v480_v62 = vstv %s1628_s12 }
  0xe7   :  { %s1644_s15 = sld [smem:[#allocation3 + $0x93]] }
  0xe8   :  { %s2254_s6 = sld [smem:[#allocation14_spill]]  ;;  %v288_v31 = vadd.f32 %v287_v16, %v284_v6 }
  0xe9   :  { %v313_v41 = vstv %s2252_s3  ;;  %s1650_s1 = sld [smem:[#allocation3 + $0x9d]] }
  0xea   :  { %v344_v45 = vstv %s2253_s17  ;;  %s2255_s14 = sld [smem:[#allocation12_spill]]  ;;  %v314_v58 = vmul.f32 %v313_v41, %v1461_v8  ;;  %v418_v41 = vstv %s1548_s26 }
  0xeb   :  { %s1654_s10 = sld [smem:[#allocation3 + $0xa7]]  ;;  %v345_v60 = vmul.f32 %v344_v45, %v1425_v43  ;;  %v419_v55 = vmul.f32 %v418_v41, %v1461_v8 }
  0xec   :  { %s1658_s3 = sld [smem:[#allocation3 + $0xb1]]  ;;  %v315_v27 = vadd.f32 %v314_v58, %v311_v17  ;;  %v422_v58 = vstv %s1552_s7 }
  0xed   :  { %s2257_s21 = sld [smem:[#allocation46_spill]]  ;;  %v346_v0 = vadd.f32 %v345_v60, %v342_v1  ;;  %v446_v60 = vmul.f32 %v445_v50, %v1609_v10  ;;  %v420_v3 = vadd.f32 %v419_v55, %v416_v54  ;;  %v423_v4 = vmul.f32 %v422_v58, %v1481_v25 }
  0xee   :  { %s2258_s17 = sld [smem:[#allocation35_spill]]  ;;  %v317_v59 = vstv %s2254_s6 }
  0xef   :  { %s1663_s25 = sld [smem:[#allocation3 + $0xbb]]  ;;  %v318_v9 = vmul.f32 %v317_v59, %v1481_v25  ;;  %v443_v59 = vadd.f32 %v442_v47, %v439_v46 }
  0xf0   :  { %s2260_s9 = sld [smem:[#allocation20_spill]]  ;;  %v348_v61 = vstv %s2255_s14 }
  0xf1   :  { %s1668_s20 = sld [smem:[#allocation3 + $0xc5]]  ;;  %v349_v18 = vmul.f32 %v348_v61, %v1461_v8  ;;  %v319_v32 = vadd.f32 %v318_v9, %v315_v27  ;;  %v477_v61 = vstv %s1623_s18  ;;  %v447_v15 = vadd.f32 %v446_v60, %v443_v59 }
  0xf2   :  { %2256 = sst [smem:[#allocation23_spill]] %s1658_s3  ;;  %v478_v27 = vmul.f32 %v477_v61, %v1582_v53  ;;  %v465_v59 = vstv %s1607_s11  ;;  %v496_v60 = vstv %s1650_s1 }
  0xf3   :  { %s2262_s3 = sld [smem:[#allocation15_spill]]  ;;  %v290_v7 = vstv %s2257_s21  ;;  %v350_v38 = vadd.f32 %v349_v18, %v346_v0  ;;  %v450_v18 = vmul.f32 %v449_v2, %v1713_v42 }
  0xf4   :  { %s1672_s6 = sld [smem:[#allocation3 + $0xcf]]  ;;  %v379_v11 = vstv %s2258_s17 }
  0xf5   :  { %2259 = sst [smem:[#allocation29_spill]] %s1663_s25  ;;  %v380_v23 = vmul.f32 %v379_v11, %v1425_v43  ;;  %v291_v43 = vadd.f32 %v290_v7, %v288_v31  ;;  %v426_v11 = vstv %s1557_s27 }
  0xf6   :  { %s1677_s14 = sld [smem:[#allocation3 + $0x6c]]  ;;  %v321_v13 = vstv %s2260_s9  ;;  %v427_v24 = vmul.f32 %v426_v11, %v1501_v44 }
  0xf7   :  { %2261 = sst [smem:[#allocation18_spill]] %s1668_s20  ;;  %v322_v33 = vmul.f32 %v321_v13, %v1501_v44  ;;  %v381_v39 = vadd.f32 %v380_v23, %v377_v22  ;;  %v481_v13 = vmul.f32 %v480_v62, %v1587_v56  ;;  %v424_v23 = vadd.f32 %v423_v4, %v420_v3 }
  0xf8   :  { %s2263_s25 = sld [smem:[#allocation13_spill]] }
  0xf9   :  { %s1682_s20 = sld [smem:[#allocation3 + $0x76]]  ;;  %v352_v19 = vstv %s2262_s3  ;;  %v323_v48 = vadd.f32 %v322_v33, %v319_v32  ;;  %v482_v30 = vadd.f32 %v481_v13, %v478_v27  ;;  %v451_v33 = vadd.f32 %v450_v18, %v447_v15 }
  0xfa   :  { %s1687_s8 = sld [smem:[#allocation3 + $0x80]]  ;;  %v353_v35 = vmul.f32 %v352_v19, %v1481_v25  ;;  %v484_v19 = vstv %s1634_s5  ;;  %v428_v37 = vadd.f32 %v427_v24, %v424_v23  ;;  %v500_v27 = vstv %s1654_s10 }
  0xfb   :  { %s2264_s21 = sld [smem:[#allocation21_spill]]  ;;  %v485_v31 = vmul.f32 %v484_v19, %v1602_v5 }
  0xfc   :  { %s1691_s17 = sld [smem:[#allocation3 + $0x8a]]  ;;  %v354_v57 = vadd.f32 %v353_v35, %v350_v38  ;;  %v520_v6 = vstv %s1677_s14  ;;  %v488_v35 = vstv %s1639_s4 }
  0xfd   :  { %s1698_s30 = sld [smem:[#allocation3 + $0x94]]  ;;  %v521_v21 = vmul.f32 %v520_v6, %v1582_v53  ;;  %v486_v41 = vadd.f32 %v485_v31, %v482_v30 }
  0xfe   :  { %v383_v28 = vstv %s2263_s25  ;;  %s2265_s13 = sld [smem:[#allocation16_spill]] }
  0xff   :  { %s1702_s3 = sld [smem:[#allocation3 + $0x9e]]  ;;  %v384_v40 = vmul.f32 %v383_v28, %v1461_v8  ;;  %v1737_v8 = vmax.f32 %v291_v43, 0.0  ;;  %v523_v7 = vstv %s1682_s20 }
 0x100   :  { %s2266_s19 = sld [smem:[#allocation26_spill]]  ;;  %v524_v0 = vmul.f32 %v523_v7, %v1587_v56  ;;  %v527_v26 = vstv %s1687_s8 }
 0x101   :  { %v356_v36 = vstv %s2264_s21  ;;  %s1707_s23 = sld [smem:[#allocation3 + $0xa8]]  ;;  %v385_v16 = vadd.f32 %v384_v40, %v381_v39  ;;  %v454_v34 = vmul.f32 %v453_v20, %v1737_v8  ;;  %v528_v12 = vmul.f32 %v527_v26, %v1602_v5 }
 0x102   :  { %s2267_s25 = sld [smem:[#allocation22_spill]]  ;;  %v357_v51 = vmul.f32 %v356_v36, %v1501_v44  ;;  %v525_v36 = vadd.f32 %v524_v0, %v521_v21  ;;  %v531_v38 = vstv %s1691_s17  ;;  %v430_v40 = vstv %s1562_s29 }
 0x103   :  { %s1711_s9 = sld [smem:[#allocation3 + $0xb2]]  ;;  %v455_v47 = vadd.f32 %v454_v34, %v451_v33  ;;  %v535_v54 = vstv %s1698_s30 }
 0x104   :  { %v387_v45 = vstv %s2265_s13  ;;  %s1717_s28 = sld [smem:[#allocation3 + $0xbc]]  ;;  %v358_v14 = vadd.f32 %v357_v51, %v354_v57  ;;  %v529_v50 = vadd.f32 %v528_v12, %v525_v36  ;;  %v532_v51 = vmul.f32 %v531_v38, %v1609_v10 }
 0x105   :  { %s1721_s21 = sld [smem:[#allocation3 + $0xc6]]  ;;  %v388_v17 = vmul.f32 %v387_v45, %v1481_v25  ;;  %v489_v45 = vmul.f32 %v488_v35, %v1609_v10  ;;  %v536_v62 = vmul.f32 %v535_v54, %v1713_v42  ;;  %v539_v3 = vstv %s1702_s3 }
 0x106   :  { %v325_v49 = vstv %s2266_s19  ;;  %s1726_s26 = sld [smem:[#allocation3 + $0xd0]]  ;;  %v533_v61 = vadd.f32 %v532_v51, %v529_v50  ;;  %v540_v18 = vmul.f32 %v539_v3, %v1737_v8 }
 0x107   :  { %s1730_s13 = sld [smem:[#allocation3 + $0x6d]]  ;;  %v326_v63 = vadd.f32 %v325_v49, %v323_v48  ;;  %v389_v9 = vadd.f32 %v388_v17, %v385_v16  ;;  %v492_v48 = vstv %s1644_s15  ;;  %v461_v49 = vstv %s1600_s24 }
 0x108   :  { %v391_v52 = vstv %s2267_s25  ;;  %s1735_s22 = sld [smem:[#allocation3 + $0x77]]  ;;  %v490_v57 = vadd.f32 %v489_v45, %v486_v41  ;;  %v493_v16 = vmul.f32 %v492_v48, %v1713_v42  ;;  %v537_v15 = vadd.f32 %v536_v62, %v533_v61 }
 0x109   :  { %v392_v1 = vmul.f32 %v391_v52, %v1501_v44  ;;  %s1741_s19 = sld [smem:[#allocation3 + $0x81]]  ;;  %v1763_v22 = vmax.f32 %v326_v63, 0.0  ;;  %v457_v44 = vstv %s1596_s0  ;;  %v431_v52 = vadd.f32 %v430_v40, %v428_v37 }
 0x10a   :  { %s2268_s7 = sld [smem:[#allocation27_spill]]  ;;  %v494_v7 = vadd.f32 %v493_v16, %v490_v57  ;;  %v543_v20 = vstv %s1707_s23  ;;  %v541_v31 = vadd.f32 %v540_v18, %v537_v15  ;;  %v547_v34 = vstv %s1711_s9 }
 0x10b   :  { %s1746_s18 = sld [smem:[#allocation3 + $0x8b]]  ;;  %v393_v28 = vadd.f32 %v392_v1, %v389_v9  ;;  %v458_v43 = vmul.f32 %v457_v44, %v1763_v22  ;;  %v1816_v2 = vmax.f32 %v431_v52, 0.0  ;;  %v497_v9 = vmul.f32 %v496_v60, %v1737_v8 }
 0x10c   :  { %s1751_s12 = sld [smem:[#allocation3 + $0x95]]  ;;  %v501_v0 = vmul.f32 %v500_v27, %v1763_v22  ;;  %v551_v48 = vstv %s1717_s28  ;;  %v555_v60 = vstv %s1721_s21 }
 0x10d   :  { %s2269_s2 = sld [smem:[#allocation28_spill]]  ;;  %v459_v17 = vadd.f32 %v458_v43, %v455_v47  ;;  %v563_v63 = vstv %s1730_s13  ;;  %v498_v21 = vadd.f32 %v497_v9, %v494_v7  ;;  %v556_v18 = vmul.f32 %v555_v60, %v1816_v2 }
 0x10e   :  { %s1755_s25 = sld [smem:[#allocation3 + $0x9f]]  ;;  %v566_v1 = vstv %s1735_s22  ;;  %v564_v13 = vmul.f32 %v563_v63, %v1582_v53 }
 0x10f   :  { %s1761_s27 = sld [smem:[#allocation3 + $0xa9]]  ;;  %v570_v19 = vstv %s1741_s19  ;;  %v502_v12 = vadd.f32 %v501_v0, %v498_v21 }
 0x110   :  { %v360_v25 = vstv %s2268_s7  ;;  %s1767_s20 = sld [smem:[#allocation3 + $0xb3]]  ;;  %v571_v30 = vmul.f32 %v570_v19, %v1602_v5 }
 0x111   :  { %s1771_s16 = sld [smem:[#allocation3 + $0xbd]]  ;;  %v361_v32 = vadd.f32 %v360_v25, %v358_v14  ;;  %v567_v14 = vmul.f32 %v566_v1, %v1587_v56  ;;  %v574_v33 = vstv %s1746_s18 }
 0x112   :  { %s1775_s5 = sld [smem:[#allocation3 + $0xc7]]  ;;  %v575_v45 = vmul.f32 %v574_v33, %v1609_v10 }
 0x113   :  { %v395_v29 = vstv %s2269_s2  ;;  %s1779_s14 = sld [smem:[#allocation3 + $0xd1]]  ;;  %v1788_v46 = vmax.f32 %v361_v32, 0.0  ;;  %v544_v32 = vmul.f32 %v543_v20, %v1763_v22 }
 0x114   :  { %s1782_s8 = sld [smem:[#allocation3 + $0x6e]]  ;;  %v396_v39 = vadd.f32 %v395_v29, %v393_v28  ;;  %v568_v29 = vadd.f32 %v567_v14, %v564_v13  ;;  %v582_v1 = vstv %s1755_s25  ;;  %v516_v13 = vstv %s1672_s6 }
 0x115   :  { %s1786_s4 = sld [smem:[#allocation3 + $0x78]]  ;;  %v462_v58 = vmul.f32 %v461_v49, %v1788_v46  ;;  %v545_v47 = vadd.f32 %v544_v32, %v541_v31  ;;  %v548_v43 = vmul.f32 %v547_v34, %v1788_v46  ;;  %v578_v49 = vstv %s1751_s12 }
 0x116   :  { %s1792_s0 = sld [smem:[#allocation3 + $0x82]]  ;;  %v1801_v55 = vmax.f32 %v396_v39, 0.0  ;;  %v572_v41 = vadd.f32 %v571_v30, %v568_v29  ;;  %v579_v62 = vmul.f32 %v578_v49, %v1713_v42  ;;  %v586_v21 = vstv %s1761_s27 }
 0x117   :  { %s1796_s29 = sld [smem:[#allocation3 + $0x8c]]  ;;  %v463_v11 = vadd.f32 %v462_v58, %v459_v17  ;;  %v549_v63 = vadd.f32 %v548_v43, %v545_v47  ;;  %v590_v30 = vstv %s1767_s20  ;;  %v594_v43 = vstv %s1771_s16 }
 0x118   :  { %s1799_s17 = sld [smem:[#allocation3 + $0x96]]  ;;  %v466_v4 = vmul.f32 %v465_v59, %v1801_v55  ;;  %v552_v59 = vmul.f32 %v551_v48, %v1801_v55  ;;  %v576_v61 = vadd.f32 %v575_v45, %v572_v41 }
 0x119   :  { %s2270_s15 = sld [smem:[#allocation36_spill]] }
 0x11a   :  { %s1804_s7 = sld [smem:[#allocation3 + $0xa0]]  ;;  %v606_v23 = vstv %s1782_s8  ;;  %v467_v26 = vadd.f32 %v466_v4, %v463_v11  ;;  %v580_v19 = vadd.f32 %v579_v62, %v576_v61  ;;  %v553_v20 = vadd.f32 %v552_v59, %v549_v63 }
 0x11b   :  { %s1809_s24 = sld [smem:[#allocation3 + $0xaa]]  ;;  %v609_v24 = vstv %s1786_s4  ;;  %v607_v35 = vmul.f32 %v606_v23, %v1582_v53 }
 0x11c   :  { %s1814_s30 = sld [smem:[#allocation3 + $0xb4]]  ;;  %v610_v44 = vmul.f32 %v609_v24, %v1587_v56  ;;  %v613_v38 = vstv %s1792_s0 }
 0x11d   :  { %s1819_s2 = sld [smem:[#allocation3 + $0xbe]]  ;;  %v614_v51 = vmul.f32 %v613_v38, %v1602_v5  ;;  %v617_v58 = vstv %s1796_s29 }
 0x11e   :  { %s1824_s11 = sld [smem:[#allocation3 + $0xc8]]  ;;  %v611_v50 = vadd.f32 %v610_v44, %v607_v35  ;;  %v618_v7 = vmul.f32 %v617_v58, %v1609_v10  ;;  %v621_v14 = vstv %s1799_s17  ;;  %v587_v35 = vmul.f32 %v586_v21, %v1763_v22 }
 0x11f   :  { %v469_v6 = vstv %s2270_s15  ;;  %s2271_s1 = sld [smem:[#allocation23_spill]] }
 0x120   :  { %s1829_s3 = sld [smem:[#allocation3 + $0xd2]]  ;;  %v470_v25 = vmul.f32 %v469_v6, %v1816_v2  ;;  %v615_v6 = vadd.f32 %v614_v51, %v611_v50  ;;  %v625_v31 = vstv %s1804_s7  ;;  %v557_v51 = vadd.f32 %v556_v18, %v553_v20 }
 0x121   :  { %s1833_s13 = sld [smem:[#allocation3 + $0x6f]]  ;;  %v626_v45 = vmul.f32 %v625_v31, %v1737_v8  ;;  %v629_v48 = vstv %s1809_s24 }
 0x122   :  { %s1837_s22 = sld [smem:[#allocation3 + $0x79]]  ;;  %v471_v39 = vadd.f32 %v470_v25, %v467_v26  ;;  %v583_v25 = vmul.f32 %v582_v1, %v1737_v8  ;;  %v619_v24 = vadd.f32 %v618_v7, %v615_v6  ;;  %v622_v26 = vmul.f32 %v621_v14, %v1713_v42 }
 0x123   :  { %s2273_s10 = sld [smem:[#allocation17_spill]]  ;;  %v630_v62 = vmul.f32 %v629_v48, %v1763_v22  ;;  %v595_v1 = vmul.f32 %v594_v43, %v1801_v55  ;;  %v637_v14 = vstv %s1819_s2 }
 0x124   :  { %s1842_s15 = sld [smem:[#allocation3 + $0x83]]  ;;  %v584_v34 = vadd.f32 %v583_v25, %v580_v19  ;;  %v623_v41 = vadd.f32 %v622_v26, %v619_v24 }
 0x125   :  { %v504_v28 = vstv %s2271_s1  ;;  %s2274_s19 = sld [smem:[#allocation29_spill]] }
 0x126   :  { %2272 = sst [smem:[#allocation37_spill]] %s1829_s3  ;;  %v505_v37 = vmul.f32 %v504_v28, %v1788_v46  ;;  %v627_v61 = vadd.f32 %v626_v45, %v623_v41 }
 0x127   :  { %s1846_s3 = sld [smem:[#allocation3 + $0x8d]]  ;;  %v649_v52 = vstv %s1833_s13 }
 0x128   :  { %s1850_s23 = sld [smem:[#allocation3 + $0x97]]  ;;  %v652_v54 = vstv %s1837_s22  ;;  %v506_v57 = vadd.f32 %v505_v37, %v502_v12  ;;  %v650_v3 = vmul.f32 %v649_v52, %v1582_v53  ;;  %v588_v52 = vadd.f32 %v587_v35, %v584_v34 }
 0x129   :  { %s1855_s8 = sld [smem:[#allocation3 + $0xa1]]  ;;  %v473_v36 = vstv %s2273_s10  ;;  %v653_v4 = vmul.f32 %v652_v54, %v1587_v56  ;;  %v598_v54 = vstv %s1775_s5  ;;  %v631_v25 = vadd.f32 %v630_v62, %v627_v61 }
 0x12a   :  { %s1860_s4 = sld [smem:[#allocation3 + $0xab]]  ;;  %v656_v9 = vstv %s1842_s15  ;;  %v1895_v11 = vadd.f32 %v473_v36, %v471_v39 }
 0x12b   :  { %v508_v40 = vstv %s2274_s19  ;;  %s2275_s9 = sld [smem:[#allocation18_spill]]  ;;  %v654_v0 = vadd.f32 %v653_v4, %v650_v3  ;;  %v657_v23 = vmul.f32 %v656_v9, %v1602_v5  ;;  %v599_v3 = vmul.f32 %v598_v54, %v1816_v2 }
 0x12c   :  { %s1864_s18 = sld [smem:[#allocation3 + $0xb5]]  ;;  %v509_v16 = vmul.f32 %v508_v40, %v1801_v55  ;;  %v475_v12 = vmax.f32 %v1895_v11, 0.0  ;;  %v591_v40 = vmul.f32 %v590_v30, %v1788_v46 }
 0x12d   :  { %s1869_s1 = sld [smem:[#allocation3 + $0xbf]]  ;;  %v660_v28 = vstv %s1846_s3  ;;  %v658_v38 = vadd.f32 %v657_v23, %v654_v0 }
 0x12e   :  { %s1874_s0 = sld [smem:[#allocation3 + $0xc9]]  ;;  %v510_v15 = vadd.f32 %v509_v16, %v506_v57  ;;  %v661_v39 = vmul.f32 %v660_v28, %v1609_v10  ;;  %v664_v47 = vstv %s1850_s23  ;;  %v559_v16 = vstv %s1726_s26 }
 0x12f   :  { %s1879_s10 = sld [smem:[#allocation3 + $0xd3]]  ;;  %v665_v59 = vmul.f32 %v664_v47, %v1713_v42  ;;  %v668_v63 = vstv %s1855_s8  ;;  %v1960_v7 = vadd.f32 %v559_v16, %v557_v51  ;;  %v592_v9 = vadd.f32 %v591_v40, %v588_v52 }
 0x130   :  { %s1884_s28 = sld [smem:[#allocation3 + $0x70]]  ;;  %v662_v58 = vadd.f32 %v661_v39, %v658_v38  ;;  %v669_v18 = vmul.f32 %v668_v63, %v1737_v8  ;;  %v672_v20 = vstv %s1860_s4 }
 0x131   :  { %v512_v17 = vstv %s2275_s9  ;;  %s1889_s12 = sld [smem:[#allocation3 + $0x7a]]  ;;  %v673_v35 = vmul.f32 %v672_v20, %v1763_v22  ;;  %v561_v48 = vmax.f32 %v1960_v7, 0.0 }
 0x132   :  { %s1893_s21 = sld [smem:[#allocation3 + $0x84]]  ;;  %v513_v27 = vmul.f32 %v512_v17, %v1816_v2  ;;  %v633_v17 = vstv %s1814_s30  ;;  %v676_v38 = vstv %s1864_s18 }
 0x133   :  { %s1900_s25 = sld [smem:[#allocation3 + $0x8e]]  ;;  %v677_v54 = vmul.f32 %v676_v38, %v1788_v46 }
 0x134   :  { %s1904_s29 = sld [smem:[#allocation3 + $0x98]]  ;;  %v514_v37 = vadd.f32 %v513_v27, %v510_v15  ;;  %v634_v27 = vmul.f32 %v633_v17, %v1788_v46  ;;  %v666_v15 = vadd.f32 %v665_v59, %v662_v58 }
 0x135   :  { %s1908_s6 = sld [smem:[#allocation3 + $0xa2]] }
 0x136   :  { %v692_v29 = vstv %s1884_s28  ;;  %s1913_s17 = sld [smem:[#allocation3 + $0xac]]  ;;  %v1949_v60 = vadd.f32 %v516_v13, %v514_v37  ;;  %v670_v34 = vadd.f32 %v669_v18, %v666_v15  ;;  %v641_v37 = vstv %s1824_s11 }
 0x137   :  { %v693_v32 = vmul.f32 %v692_v29, %v1582_v53  ;;  %v695_v33 = vstv %s1889_s12  ;;  %s1919_s27 = sld [smem:[#allocation3 + $0xb6]]  ;;  %v596_v29 = vadd.f32 %v595_v1, %v592_v9  ;;  %v642_v16 = vmul.f32 %v641_v37, %v1816_v2 }
 0x138   :  { %v696_v44 = vmul.f32 %v695_v33, %v1587_v56  ;;  %v699_v36 = vstv %s1893_s21  ;;  %s1924_s3 = sld [smem:[#allocation3 + $0xc0]]  ;;  %v638_v33 = vmul.f32 %v637_v14, %v1801_v55  ;;  %v518_v43 = vmax.f32 %v1949_v60, 0.0 }
 0x139   :  { %s1928_s20 = sld [smem:[#allocation3 + $0xca]]  ;;  %v700_v50 = vmul.f32 %v699_v36, %v1602_v5  ;;  %v703_v57 = vstv %s1900_s25  ;;  %v635_v36 = vadd.f32 %v634_v27, %v631_v25  ;;  %v600_v51 = vadd.f32 %v599_v3, %v596_v29 }
 0x13a   :  { %s1933_s7 = sld [smem:[#allocation3 + $0xd4]]  ;;  %v697_v49 = vadd.f32 %v696_v44, %v693_v32  ;;  %v704_v6 = vmul.f32 %v703_v57, %v1609_v10  ;;  %v707_v13 = vstv %s1904_s29  ;;  %v674_v52 = vadd.f32 %v673_v35, %v670_v34 }
 0x13b   :  { %s1938_s13 = sld [smem:[#allocation3 + $0x71]]  ;;  %v708_v24 = vmul.f32 %v707_v13, %v1713_v42  ;;  %v711_v30 = vstv %s1908_s6  ;;  %v680_v57 = vstv %s1869_s1  ;;  %v639_v61 = vadd.f32 %v638_v33, %v635_v36 }
 0x13c   :  { %s1942_s22 = sld [smem:[#allocation3 + $0x7b]]  ;;  %v701_v4 = vadd.f32 %v700_v50, %v697_v49  ;;  %v712_v41 = vmul.f32 %v711_v30, %v1737_v8  ;;  %v602_v49 = vstv %s1779_s14  ;;  %v715_v50 = vstv %s1913_s17 }
 0x13d   :  { %s1947_s16 = sld [smem:[#allocation3 + $0x85]]  ;;  %v716_v1 = vmul.f32 %v715_v50, %v1763_v22  ;;  %v681_v3 = vmul.f32 %v680_v57, %v1801_v55  ;;  %v678_v27 = vadd.f32 %v677_v54, %v674_v52  ;;  %v688_v57 = vstv %s1879_s10 }
 0x13e   :  { %s1953_s5 = sld [smem:[#allocation3 + $0x8f]]  ;;  %v705_v23 = vadd.f32 %v704_v6, %v701_v4  ;;  %v684_v4 = vstv %s1874_s0  ;;  %v719_v6 = vstv %s1919_s27 }
 0x13f   :  { %s1958_s26 = sld [smem:[#allocation3 + $0x99]]  ;;  %v682_v38 = vadd.f32 %v681_v3, %v678_v27 }
 0x140   :  { %s1964_s24 = sld [smem:[#allocation3 + $0xa3]]  ;;  %v709_v40 = vadd.f32 %v708_v24, %v705_v23 }
 0x141   :  { %v735_v19 = vstv %s1938_s13  ;;  %s1969_s30 = sld [smem:[#allocation3 + $0xad]] }
 0x142   :  { %v736_v21 = vmul.f32 %v735_v19, %v1582_v53  ;;  %v738_v0 = vstv %s1942_s22  ;;  %s1974_s15 = sld [smem:[#allocation3 + $0xb7]]  ;;  %v713_v63 = vadd.f32 %v712_v41, %v709_v40 }
 0x143   :  { %v739_v26 = vmul.f32 %v738_v0, %v1587_v56  ;;  %v742_v28 = vstv %s1947_s16  ;;  %s1979_s2 = sld [smem:[#allocation3 + $0xc1]]  ;;  %v720_v0 = vmul.f32 %v719_v6, %v1788_v46 }
 0x144   :  { %v743_v31 = vmul.f32 %v742_v28, %v1602_v5  ;;  %v746_v32 = vstv %s1953_s5  ;;  %s1984_s19 = sld [smem:[#allocation3 + $0xcb]] }
 0x145   :  { %v740_v44 = vadd.f32 %v739_v26, %v736_v21  ;;  %s1988_s23 = sld [smem:[#allocation3 + $0xd5]]  ;;  %v747_v39 = vmul.f32 %v746_v32, %v1609_v10  ;;  %v750_v47 = vstv %s1958_s26  ;;  %v717_v21 = vadd.f32 %v716_v1, %v713_v63 }
 0x146   :  { %s1993_s8 = sld [smem:[#allocation3 + $0x72]]  ;;  %v751_v58 = vmul.f32 %v750_v47, %v1713_v42  ;;  %v754_v59 = vstv %s1964_s24  ;;  %v723_v26 = vstv %s1924_s3  ;;  %v685_v32 = vmul.f32 %v684_v4, %v1816_v2 }
 0x147   :  { %v744_v45 = vadd.f32 %v743_v31, %v740_v44  ;;  %s1997_s4 = sld [smem:[#allocation3 + $0x7c]]  ;;  %v755_v13 = vmul.f32 %v754_v59, %v1737_v8  ;;  %v758_v19 = vstv %s1969_s30  ;;  %v643_v31 = vadd.f32 %v642_v16, %v639_v61 }
 0x148   :  { %s2276_s9 = sld [smem:[#allocation37_spill]]  ;;  %v759_v33 = vmul.f32 %v758_v19, %v1763_v22  ;;  %v762_v44 = vstv %s1974_s15  ;;  %v724_v40 = vmul.f32 %v723_v26, %v1801_v55  ;;  %v727_v47 = vstv %s1928_s20 }
 0x149   :  { %s2003_s11 = sld [smem:[#allocation3 + $0x86]]  ;;  %v748_v17 = vadd.f32 %v747_v39, %v744_v45  ;;  %v721_v39 = vadd.f32 %v720_v0, %v717_v21  ;;  %v2057_v45 = vadd.f32 %v602_v49, %v600_v51  ;;  %v763_v16 = vmul.f32 %v762_v44, %v1788_v46 }
 0x14a   :  { %s2007_s18 = sld [smem:[#allocation3 + $0x90]]  ;;  %v766_v49 = vstv %s1979_s2  ;;  %v686_v61 = vadd.f32 %v685_v32, %v682_v38 }
 0x14b   :  { %s2012_s14 = sld [smem:[#allocation3 + $0x9a]]  ;;  %v752_v18 = vadd.f32 %v751_v58, %v748_v17  ;;  %v725_v63 = vadd.f32 %v724_v40, %v721_v39  ;;  %v767_v27 = vmul.f32 %v766_v49, %v1801_v55 }
 0x14c   :  { %s2016_s28 = sld [smem:[#allocation3 + $0xa4]]  ;;  %v778_v9 = vstv %s1993_s8 }
 0x14d   :  { %s2022_s1 = sld [smem:[#allocation3 + $0xae]]  ;;  %v779_v14 = vmul.f32 %v778_v9, %v1582_v53  ;;  %v781_v15 = vstv %s1997_s4  ;;  %v756_v35 = vadd.f32 %v755_v13, %v752_v18 }
 0x14e   :  { %v645_v62 = vstv %s2276_s9  ;;  %s2027_s12 = sld [smem:[#allocation3 + $0xb8]]  ;;  %v782_v25 = vmul.f32 %v781_v15, %v1587_v56 }
 0x14f   :  { %v785_v20 = vstv %s2003_s11  ;;  %s2032_s0 = sld [smem:[#allocation3 + $0xc2]]  ;;  %v2063_v54 = vadd.f32 %v645_v62, %v643_v31  ;;  %v760_v58 = vadd.f32 %v759_v33, %v756_v35  ;;  %v728_v62 = vmul.f32 %v727_v47, %v1816_v2  ;;  %s1206_s11 = smov [#allocation7]  }
 0x150   :  { %v786_v23 = vmul.f32 %v785_v20, %v1602_v5  ;;  %v789_v24 = vstv %s2007_s18  ;;  %s2037_s21 = sld [smem:[#allocation3 + $0xcc]]  ;;  %v783_v28 = vadd.f32 %v782_v25, %v779_v14  ;;  %v604_v35 = vmax.f32 %v2057_v45, 0.0  ;;  %s912_s18 = sshll.u32 %s1206_s11, 4  ;;  %s913_s18 = int_to_ptr.vmem [resolvable:$true] %s912_s18 }
 0x151   :  { %v790_v29 = vmul.f32 %v789_v24, %v1609_v10  ;;  %v793_v30 = vstv %s2012_s14  ;;  %s2042_s25 = sld [smem:[#allocation3 + $0xd6]]  ;;  %v764_v18 = vadd.f32 %v763_v16, %v760_v58  ;;  %v647_v44 = vmax.f32 %v2063_v54, 0.0  ;;  %s1178_s14 = scalar_lea.vmem %s913_s18, 128 }
 0x152   :  { %v797_v34 = vstv %s2016_s28  ;;  %s2047_s29 = sld [smem:[#allocation3 + $0x73]]  ;;  %v787_v36 = vadd.f32 %v786_v23, %v783_v28  ;;  %v794_v37 = vmul.f32 %v793_v30, %v1713_v42  ;;  %v774_v45 = vstv %s1988_s23  ;;  %p1179_p5 = scmp.ne.s32.totalorder %s913_s18, %s1178_s14 }
 0x153   :  { %s2051_s6 = sld [smem:[#allocation3 + $0x7d]]  ;;  %v801_v41 = vstv %s2022_s1  ;;  %v798_v52 = vmul.f32 %v797_v34, %v1737_v8  ;;  %v768_v32 = vadd.f32 %v767_v27, %v764_v18  ;;  %p1183_p6 = scmp.lt.s32.totalorder %s913_s18, %s913_s18 }
 0x154   :  { %s2055_s17 = sld [smem:[#allocation3 + $0x87]]  ;;  %v791_v50 = vadd.f32 %v790_v29, %v787_v36  ;;  %v805_v17 = vstv %s2027_s12  ;;  %v802_v59 = vmul.f32 %v801_v41, %v1763_v22  ;;  %p1184_p7 = scmp.lt.s32.totalorder %s1178_s14, %s1178_s14 }
 0x155   :  { %s2061_s27 = sld [smem:[#allocation3 + $0x91]]  ;;  %v806_v4 = vmul.f32 %v805_v17, %v1788_v46  ;;  %v809_v13 = vstv %s2032_s0 }
 0x156   :  { %s2068_s3 = sld [smem:[#allocation3 + $0x9b]]  ;;  %v795_v51 = vadd.f32 %v794_v37, %v791_v50  ;;  %v810_v26 = vmul.f32 %v809_v13, %v1801_v55  ;;  %v813_v29 = vstv %s2037_s21  ;;  %p1185_p8 = por %p1184_p7, %p1183_p6 }
 0x157   :  { %s2072_s20 = sld [smem:[#allocation3 + $0xa5]]  ;;  %v814_v39 = vmul.f32 %v813_v29, %v1816_v2 }
 0x158   :  { %v821_v1 = vstv %s2047_s29  ;;  %s2076_s10 = sld [smem:[#allocation3 + $0xaf]]  ;;  %v799_v3 = vadd.f32 %v798_v52, %v795_v51  ;;  %v817_v52 = vstv %s2042_s25  ;;  %p1186_p9 = pnand %p1185_p8, %p1179_p5 }
 0x159   :  { %v822_v6 = vmul.f32 %v821_v1, %v1582_v53  ;;  %v824_v9 = vstv %s2051_s6  ;;  %s2081_s13 = sld [smem:[#allocation3 + $0xb9]]  ;;  %v770_v53 = vstv %s1984_s19 }
 0x15a   :  { %v825_v14 = vmul.f32 %v824_v9, %v1587_v56  ;;  %v828_v15 = vstv %s2055_s17  ;;  %s2087_s22 = sld [smem:[#allocation3 + $0xc3]]  ;;  %v803_v19 = vadd.f32 %v802_v59, %v799_v3  ;;  %v2098_v56 = vadd.f32 %v688_v57, %v686_v61 }
 0x15b   :  { %v829_v25 = vmul.f32 %v828_v15, %v1602_v5  ;;  %v832_v20 = vstv %s2061_s27  ;;  %s2091_s16 = sld [smem:[#allocation3 + $0xcd]]  ;;  %v729_v5 = vadd.f32 %v728_v62, %v725_v63  ;;  %v771_v33 = vmul.f32 %v770_v53, %v1816_v2 }
 0x15c   :  { %v826_v21 = vadd.f32 %v825_v14, %v822_v6  ;;  %v833_v0 = vmul.f32 %v832_v20, %v1609_v10  ;;  %v836_v23 = vstv %s2068_s3  ;;  %s2096_s5 = sld [smem:[#allocation3 + $0xd7]]  ;;  %v807_v24 = vadd.f32 %v806_v4, %v803_v19 }
 0x15d   :  { %v840_v28 = vstv %s2072_s20  ;;  %s2102_s26 = sld [smem:[#allocation3 + $0xd8]]  ;;  %v837_v31 = vmul.f32 %v836_v23, %v1713_v42  ;;  %v731_v10 = vstv %s1933_s7  ;;  %v690_v37 = vmax.f32 %v2098_v56, 0.0 }
 0x15e   :  { %v830_v30 = vadd.f32 %v829_v25, %v826_v21  ;;  %s2106_s24 = sld [smem:[#allocation3 + $0xd9]]  ;;  %v844_v34 = vstv %s2076_s10  ;;  %v841_v42 = vmul.f32 %v840_v28, %v1737_v8  ;;  %v811_v38 = vadd.f32 %v810_v26, %v807_v24 }
 0x15f   :  { %s2111_s30 = sld [smem:[#allocation3 + $0xda]]  ;;  %v848_v40 = vstv %s2081_s13  ;;  %v732_v41 = vadd.f32 %v731_v10, %v729_v5  ;;  %v845_v50 = vmul.f32 %v844_v34, %v1763_v22  ;;  %v772_v8 = vadd.f32 %v771_v33, %v768_v32 }
 0x160   :  { %v834_v36 = vadd.f32 %v833_v0, %v830_v30  ;;  %s2116_s15 = sld [smem:[#allocation3 + $0xdb]]  ;;  %v852_v54 = vstv %s2087_s22  ;;  %v849_v17 = vmul.f32 %v848_v40, %v1788_v46  ;;  %v815_v22 = vadd.f32 %v814_v39, %v811_v38 }
 0x161   :  { %s2121_s7 = sld [smem:[#allocation3 + $0xdc]]  ;;  %v856_v51 = vstv %s2091_s16  ;;  %v853_v62 = vmul.f32 %v852_v54, %v1801_v55  ;;  %v733_v9 = vmax.f32 %v732_v41, 0.0 }
 0x162   :  { %v838_v47 = vadd.f32 %v837_v31, %v834_v36  ;;  %s2125_s2 = sld [smem:[#allocation3 + $0xdd]]  ;;  %v857_v60 = vmul.f32 %v856_v51, %v1816_v2  ;;  %v818_v55 = vadd.f32 %v817_v52, %v815_v22  ;;  %v860_v15 = vstv %s2096_s5 }
 0x163   :  { %v864_v57 = vstv %s2102_s26  ;;  %s2130_s19 = sld [smem:[#allocation3 + $0xde]] }
 0x164   :  { %v842_v16 = vadd.f32 %v841_v42, %v838_v47  ;;  %v865_v58 = vmul.f32 %v864_v57, %v475_v12  ;;  %v867_v49 = vstv %s2106_s24  ;;  %s2136_s23 = sld [smem:[#allocation3 + $0xdf]]  ;;  %v775_v12 = vadd.f32 %v774_v45, %v772_v8 }
 0x165   :  { %v868_v59 = vmul.f32 %v867_v49, %v518_v43  ;;  %v871_v61 = vstv %s2111_s30  ;;  %s2146_s8 = sld [smem:[#allocation3 + $0xe0]]  ;;  %v819_v53 = vmax.f32 %v818_v55, 0.0 }
 0x166   :  { %v846_v63 = vadd.f32 %v845_v50, %v842_v16  ;;  %v872_v46 = vmul.f32 %v871_v61, %v561_v48  ;;  %v875_v11 = vstv %s2116_s15  ;;  %s1145_s4 = sld [smem:[#allocation3 + $0xe1]]  ;;  %v776_v14 = vmax.f32 %v775_v12, 0.0 }
 0x167   :  { %v869_v1 = vadd.f32 %v868_v59, %v865_v58  ;;  %v876_v3 = vmul.f32 %v875_v11, %v604_v35  ;;  %v879_v4 = vstv %s2121_s7  ;;  %s1146_s9 = sld [smem:[#allocation3 + $0xe2]] }
 0x168   :  { %v850_v6 = vadd.f32 %v849_v17, %v846_v63  ;;  %v883_v43 = vstv %s2125_s2  ;;  %v880_v48 = vmul.f32 %v879_v4, %v647_v44 }
 0x169   :  { %v873_v7 = vadd.f32 %v872_v46, %v869_v1  ;;  %v887_v13 = vstv %s2130_s19  ;;  %v884_v19 = vmul.f32 %v883_v43, %v690_v37 }
 0x16a   :  { %v854_v27 = vadd.f32 %v853_v62, %v850_v6  ;;  %v891_v20 = vstv %s2136_s23  ;;  %v888_v0 = vmul.f32 %v887_v13, %v733_v9 }
 0x16b   :  { %v877_v18 = vadd.f32 %v876_v3, %v873_v7  ;;  %v895_v2 = vstv %s2146_s8  ;;  %v892_v24 = vmul.f32 %v891_v20, %v776_v14 }
 0x16c   :  { %v858_v25 = vadd.f32 %v857_v60, %v854_v27  ;;  %v899_v28 = vstv %s1145_s4  ;;  %v896_v29 = vmul.f32 %v895_v2, %v819_v53 }
 0x16d   :  { %v881_v21 = vadd.f32 %v880_v48, %v877_v18  ;;  %v903_v32 = vstv %s1146_s9 }
 0x16e   :  { %v861_v23 = vadd.f32 %v860_v15, %v858_v25 }
 0x16f   :  { %v885_v56 = vadd.f32 %v884_v19, %v881_v21 }
 0x170   :  { %v862_v26 = vmax.f32 %v861_v23, 0.0 }
 0x171   :  { %v889_v5 = vadd.f32 %v888_v0, %v885_v56 }
 0x172   :  { %v900_v31 = vmul.f32 %v899_v28, %v862_v26 }
 0x173   :  { %v893_v30 = vadd.f32 %v892_v24, %v889_v5 }
 0x175   :  { %v897_v10 = vadd.f32 %v896_v29, %v893_v30 }
 0x177   :  { %v901_v33 = vadd.f32 %v900_v31, %v897_v10 }
 0x179   :  { %v904_v34 = vadd.f32 %v903_v32, %v901_v33 }
 0x17b   :  { %905 = vst [vmem:[#allocation7] sm:$0xff] %v904_v34 }
 0x17c   :  { %1189 = shalt.err (!%p1186_p9)
}
 0x17d   :  { %s2277_s12 = sld [smem:[#allocation47_spill]] }
 0x183   :  { %915 = dma.vmem_to_hbm [thread:$0]  %s913_s18, 128, %s2277_s12, [#allocation6]  }
 0x184   :  { %1202 = dma.done.wait [#allocation6], 128  }
 0x185   :  { %1203 = vsyncadd [#allocation6], 4294967168 }
 0x186   :  { %919 = vsyncpa [#allocation5], 1 }
 0x187   :  { %920 = vsyncpa [#allocation6], 1 }

</bundles_post_ra>
